<compile_context>
chip_gen: v7x
topology: tpu7x:2x2x1
jax: 0.10.0
libtpu: 0.0.40
codegen_flags: <defaults>
</compile_context>

<pallas_src>
from functools import partial

import jax
import jax.numpy as jnp
from jax.experimental import pallas as pl
from jax.experimental.pallas import tpu as pltpu


# ----------------------------------------------------------------------------- kernels


def _attend_and_project(q, k, v, wp_ref, bp_ref, o_ref, *, bt, n, s, num_heads, cdt):
    """q: (bt*n, C) f32, k/v: (bt*s, C) f32 -> writes (bt, n, out_dim) into o_ref."""
    c = q.shape[-1]
    hd = c // num_heads
    out_dim = o_ref.shape[-1]
    # Exact reciprocal only when the whole pipeline is f32 (correctness-test path);
    # the default bf16 MXU path uses the (effectively free) EUP approximate reciprocal.
    approx = jnp.dtype(cdt) != jnp.dtype(jnp.float32)

    # Single cast pass to the MXU operand dtype; the f32 projection copies die here.
    qc = q.astype(cdt).reshape(bt, n, c)
    kc = k.astype(cdt).reshape(bt, s, c)
    vc = v.astype(cdt).reshape(bt, s, c)

    ctx_parts = []
    for h in range(num_heads):                       # static, small head loop
        sl = slice(h * hd, (h + 1) * hd)
        q_h = qc[:, :, sl]                           # (bt, n, hd)
        k_h = kc[:, :, sl]                           # (bt, s, hd)
        v_h = vc[:, :, sl]                           # (bt, s, hd)

        logits = jnp.einsum('bnd,bsd->bns', q_h, k_h,
                            preferred_element_type=jnp.float32)          # (bt, n, s)
        m = jnp.max(logits, axis=-1, keepdims=True)
        e = jnp.exp(logits - m)
        l = jnp.sum(e, axis=-1, keepdims=True)
        # attn_drop is identity (p = 0.0).  Deferred normalization: PV first, then scale
        # the small (bt, n, hd) context by 1/l.
        ctx = jnp.einsum('bns,bsd->bnd', e.astype(cdt), v_h,
                         preferred_element_type=jnp.float32)              # (bt, n, hd)
        ctx_parts.append(ctx * pl.reciprocal(l, approx=approx))

    # Concat heads -> ONE K=C output-projection GEMM (full MXU depth) instead of H K=hd GEMMs.
    ctx_all = jnp.concatenate(ctx_parts, axis=-1).reshape(bt * n, c).astype(cdt)
    out = jnp.dot(ctx_all, wp_ref[...], preferred_element_type=jnp.float32)
    out = out + bp_ref[...].astype(jnp.float32)      # proj_drop is identity (p = 0.0)
    o_ref[...] = out.reshape(bt, n, out_dim).astype(o_ref.dtype)


def _mha_self_kernel(x_ref, wqkv_ref, wp_ref, bp_ref, o_ref, *, num_heads):
    """Self-attention fast path (key=value=query): fused (C, 3C) QKV projection."""
    bt, n, c = x_ref.shape
    cdt = wqkv_ref.dtype                              # MXU operand dtype (bf16 by default)
    x = x_ref[...].reshape(bt * n, c).astype(cdt)
    # softmax scale was folded into the Wq slice of wqkv at wrapper time
    qkv = jnp.dot(x, wqkv_ref[...], preferred_element_type=jnp.float32)   # (bt*n, 3C)
    q = qkv[:, :c]
    k = qkv[:, c:2 * c]
    v = qkv[:, 2 * c:]
    _attend_and_project(q, k, v, wp_ref, bp_ref, o_ref,
                        bt=bt, n=n, s=n, num_heads=num_heads, cdt=cdt)


def _mha_cross_kernel(q_ref, k_ref, v_ref, wq_ref, wk_ref, wv_ref, wp_ref, bp_ref, o_ref,
                      *, num_heads):
    """General path: distinct query / key / value tensors."""
    bt, n, c = q_ref.shape
    s = k_ref.shape[1]
    cdt = wq_ref.dtype
    xq = q_ref[...].reshape(bt * n, c).astype(cdt)
    xk = k_ref[...].reshape(bt * s, c).astype(cdt)
    xv = v_ref[...].reshape(bt * s, c).astype(cdt)
    q = jnp.dot(xq, wq_ref[...], preferred_element_type=jnp.float32)   # scale pre-folded into Wq
    k = jnp.dot(xk, wk_ref[...], preferred_element_type=jnp.float32)
    v = jnp.dot(xv, wv_ref[...], preferred_element_type=jnp.float32)
    _attend_and_project(q, k, v, wp_ref, bp_ref, o_ref,
                        bt=bt, n=n, s=s, num_heads=num_heads, cdt=cdt)


# ----------------------------------------------------------------------------- sizing helpers


def _chip_vmem_budget():
    """Return (vmem_budget_bytes, prefer_multi_step).

    Budget ~= min(3/4 of per-core VMEM, capacity - 16 MiB):
      v7x  (64 MiB/core)  -> ~48 MiB, and prefer >=2 grid steps (2 TensorCores/chip)
      v5e/v6e (128 MiB)   -> ~96 MiB, grid=1 is fine (single TensorCore)
    """
    mib = 1024 * 1024
    try:
        cap = int(pltpu.get_tpu_info().vmem_capacity_bytes)
    except Exception:
        cap = 64 * mib                      # conservative fallback (v7x-sized core)
    budget = max(min((cap * 3) // 4, cap - 16 * mib), 16 * mib)
    prefer_multi = cap <= 64 * mib          # 64 MiB cores => v7x megacore
    return budget, prefer_multi


def _pick_block_b(B, N, S, C, out_dim, in_bytes, out_bytes, cdt_bytes,
                  weight_bytes, budget, self_attn, prefer_multi):
    """Largest batch block whose estimated VMEM footprint fits `budget`; on 2-TC chips
    prefer a block that leaves >=2 grid steps so both TensorCores get work."""

    def est(bt):
        tq, tkv = bt * N, bt * S
        vm = weight_bytes                                         # single-buffered weights
        if self_attn:
            vm += 2 * tq * C * in_bytes                           # input tiles (double-buffered)
        else:
            vm += 2 * (tq + 2 * tkv) * C * in_bytes               # q/k/v input tiles
        vm += 2 * tq * out_dim * out_bytes                        # output tiles (double-buffered)
        vm += (tq + 2 * tkv) * C * (4 + cdt_bytes)                # f32 projections + MXU-dtype casts
        vm += 2 * bt * N * S * 4                                  # logits + exp for one head
        vm += tq * C * (4 + cdt_bytes) + tq * out_dim * 4         # ctx slab + f32 projection out
        return vm

    divisors = [d for d in range(B, 0, -1) if B % d == 0]         # descending
    fitting = [d for d in divisors if est(d) <= budget]
    if not fitting:
        return 1
    if prefer_multi:
        multi = [d for d in fitting if B // d >= 2]
        if multi:
            return multi[0]
    return fitting[0]


# ----------------------------------------------------------------------------- wrapper


def attention(query, key, value, wq, wk, wv, wp, bp, *, num_heads, qk_scale=None,
              block_b=None, weight_dtype=jnp.bfloat16, vmem_limit_bytes=None):
    """query: (B, N, C); key/value: (B, S, C) or None (module defaults key=query, value=key).
    Weights are PyTorch-Linear shaped: wq/wk/wv (C, C), wp (out_dim, C), bp (out_dim,).
    MXU operands default to bf16 with f32 accumulation; pass weight_dtype=jnp.float32 for f32."""
    self_attn = key is None and (value is None or value is key or value is query)
    if key is None:
        key = query
    if value is None:
        value = key

    B, N, C = query.shape
    S = key.shape[1]
    out_dim = wp.shape[0]
    hd = C // num_heads
    scale = float(qk_scale) if qk_scale is not None else float(hd) ** (-0.5)

    wdt = jnp.dtype(weight_dtype) if weight_dtype is not None else jnp.dtype(query.dtype)
    in_bytes = jnp.dtype(query.dtype).itemsize
    out_bytes = in_bytes
    cdt_bytes = wdt.itemsize

    # Pre-transpose to (C_in, C_out); fold the softmax scale into Wq (one-time O(C^2) op).
    wqt = (wq.T * scale).astype(wdt)
    wkt = wk.T.astype(wdt)
    wvt = wv.T.astype(wdt)
    wpt = wp.T.astype(wdt)
    bias = jnp.asarray(bp, jnp.float32).reshape(1, out_dim)       # bias stays f32

    if self_attn:
        wqkv = jnp.concatenate([wqt, wkt, wvt], axis=1)           # (C, 3C) fused QKV weight
        weight_bytes = (wqkv.size + wpt.size) * cdt_bytes + bias.size * 4
    else:
        wqkv = None
        weight_bytes = (wqt.size + wkt.size + wvt.size + wpt.size) * cdt_bytes + bias.size * 4

    budget, prefer_multi = _chip_vmem_budget()
    if vmem_limit_bytes is not None:
        budget = int(vmem_limit_bytes)

    bt = block_b if block_b is not None else _pick_block_b(
        B, N, S, C, out_dim, in_bytes, out_bytes, cdt_bytes,
        weight_bytes, budget, self_attn, prefer_multi)
    assert B % bt == 0, "block_b must divide the batch size"

    cparams = pltpu.CompilerParams(
        dimension_semantics=("parallel",),
        vmem_limit_bytes=int(budget),
    )

    def call(buffered_weights):
        def wspec(shape):
            # Constant index_map: fetched once by the pipeline.  Single-buffered when supported
            # so constant weight tiles do not waste double-buffer VMEM (critical on v7x).
            if buffered_weights:
                return pl.BlockSpec(shape, lambda b: (0, 0), pipeline_mode=pl.Buffered(1))
            return pl.BlockSpec(shape, lambda b: (0, 0))

        if self_attn:
            kern = partial(_mha_self_kernel, num_heads=num_heads)
            in_specs = [
                pl.BlockSpec((bt, N, C), lambda b: (b, 0, 0)),    # x block (DMA'd once)
                wspec((C, 3 * C)),                                # fused Wqkv^T (scale folded in)
                wspec((C, out_dim)),                              # Wproj^T
                wspec((1, out_dim)),                              # proj bias
            ]
            args = (query, wqkv, wpt, bias)
        else:
            kern = partial(_mha_cross_kernel, num_heads=num_heads)
            in_specs = [
                pl.BlockSpec((bt, N, C), lambda b: (b, 0, 0)),    # query block
                pl.BlockSpec((bt, S, C), lambda b: (b, 0, 0)),    # key block
                pl.BlockSpec((bt, S, C), lambda b: (b, 0, 0)),    # value block
                wspec((C, C)),                                    # Wq^T (scale folded in)
                wspec((C, C)),                                    # Wk^T
                wspec((C, C)),                                    # Wv^T
                wspec((C, out_dim)),                              # Wproj^T
                wspec((1, out_dim)),                              # proj bias
            ]
            args = (query, key, value, wqt, wkt, wvt, wpt, bias)

        return pl.pallas_call(
            kern,
            out_shape=jax.ShapeDtypeStruct((B, N, out_dim), query.dtype),
            grid_spec=pltpu.PrefetchScalarGridSpec(
                num_scalar_prefetch=0,
                grid=(B // bt,),
                in_specs=in_specs,
                out_specs=pl.BlockSpec((bt, N, out_dim), lambda b: (b, 0, 0)),
            ),
            compiler_params=cparams,
        )(*args)

    try:
        return call(True)
    except Exception:
        # Fallback if this JAX build rejects pipeline_mode=pl.Buffered(1) on weight specs.
        return call(False)


# ----------------------------------------------------------------------------- reference


def reference(query, key, value, wq, wk, wv, wp, bp, *, num_heads, qk_scale=None):
    """Pure-JAX reference mirroring the PyTorch forward (qkv_fuse=False, mask=None)."""
    B, N, C = query.shape
    S = key.shape[1]
    hd = C // num_heads
    scale = qk_scale if qk_scale is not None else hd ** (-0.5)
    q = (query @ wq.T).reshape(B, N, num_heads, hd).transpose(0, 2, 1, 3)
    k = (key @ wk.T).reshape(B, S, num_heads, hd).transpose(0, 2, 1, 3)
    v = (value @ wv.T).reshape(B, S, num_heads, hd).transpose(0, 2, 1, 3)
    attn = jnp.einsum('bhnd,bhsd->bhns', q, k) * scale
    attn = jax.nn.softmax(attn, axis=-1)
    out = jnp.einsum('bhns,bhsd->bhnd', attn, v)
    out = out.transpose(0, 2, 1, 3).reshape(B, N, C)
    return out @ wp.T + bp


# ----------------------------------------------------------------------------- demo / checks


if __name__ == "__main__":
    B, N, C = 2, 16, 128          # lane-dense channels (C multiple of 128)
    num_heads = 4                 # hd = 32
    S_cross = 32                  # cross-attention key/value length

    key0 = jax.random.PRNGKey(0)
    k_x, k_kv, k_wq, k_wk, k_wv, k_wp, k_bp = jax.random.split(key0, 7)

    # deterministic parameter init (PyTorch Linear-style uniform bound 1/sqrt(C))
    bound = 1.0 / (C ** 0.5)
    query = jax.random.normal(k_x, (B, N, C), dtype=jnp.float32)
    key_in = jax.random.normal(k_kv, (B, S_cross, C), dtype=jnp.float32)
    wq = jax.random.uniform(k_wq, (C, C), jnp.float32, -bound, bound)
    wk = jax.random.uniform(k_wk, (C, C), jnp.float32, -bound, bound)
    wv = jax.random.uniform(k_wv, (C, C), jnp.float32, -bound, bound)
    wp = jax.random.uniform(k_wp, (C, C), jnp.float32, -bound, bound)
    bp = jax.random.uniform(k_bp, (C,), jnp.float32, -bound, bound)

    # References at full f32 matmul precision (avoid XLA's default bf16 matmul passes).
    with jax.default_matmul_precision("float32"):
        ref_self = reference(query, query, query, wq, wk, wv, wp, bp, num_heads=num_heads)
        ref_cross = reference(query, key_in, key_in, wq, wk, wv, wp, bp, num_heads=num_heads)

    # --- self-attention fast path (module defaults: key=None -> query, value=None -> key) ---
    out_f32 = attention(query, None, None, wq, wk, wv, wp, bp,
                        num_heads=num_heads, weight_dtype=jnp.float32)
    out_f32 = jax.block_until_ready(out_f32)
    assert out_f32.shape == (B, N, C)
    assert jnp.allclose(out_f32, ref_self, atol=5e-4, rtol=1e-3), "f32 self-attn kernel mismatch"

    out_bf16 = attention(query, None, None, wq, wk, wv, wp, bp, num_heads=num_heads)  # bf16 default
    out_bf16 = jax.block_until_ready(out_bf16)
    assert jnp.allclose(out_bf16, ref_self, atol=3e-2, rtol=3e-2), "bf16 self-attn kernel mismatch"

    # --- cross-attention path (key given, value defaults to key) ---
    out_xf32 = attention(query, key_in, None, wq, wk, wv, wp, bp,
                         num_heads=num_heads, weight_dtype=jnp.float32)
    out_xf32 = jax.block_until_ready(out_xf32)
    assert out_xf32.shape == (B, N, C)
    assert jnp.allclose(out_xf32, ref_cross, atol=5e-4, rtol=1e-3), "f32 cross-attn kernel mismatch"

    out_xbf16 = attention(query, key_in, None, wq, wk, wv, wp, bp, num_heads=num_heads)
    out_xbf16 = jax.block_until_ready(out_xbf16)
    assert jnp.allclose(out_xbf16, ref_cross, atol=3e-2, rtol=3e-2), "bf16 cross-attn kernel mismatch"

    print("KERNEL_OK")
</pallas_src>

<mosaic_0001>
module attributes {stable_mosaic.version = 11 : i64} {
  func.func @_mha_self_kernel(%arg0: i32, %arg1: memref<1x16x128xf32, #tpu.memory_space<vmem>>, %arg2: memref<128x384xf32, #tpu.memory_space<vmem>>, %arg3: memref<128x128xf32, #tpu.memory_space<vmem>>, %arg4: memref<1x128xf32, #tpu.memory_space<vmem>>, %arg5: memref<1x16x128xf32, #tpu.memory_space<vmem>>) attributes {dimension_semantics = [#tpu.dimension_semantics<parallel>], iteration_bounds = array<i64: 2>, scalar_prefetch = 0 : i64, scratch_operands = 0 : i64, tpu.core_type = #tpu.core_type<tc>, window_params = [{transform_indices = @transform_0, window_bounds = array<i64: 1, 16, 128>}, {pipeline_mode = #tpu.pipeline_mode<synchronous>, transform_indices = @transform_1, window_bounds = array<i64: 128, 384>}, {pipeline_mode = #tpu.pipeline_mode<synchronous>, transform_indices = @transform_2, window_bounds = array<i64: 128, 128>}, {pipeline_mode = #tpu.pipeline_mode<synchronous>, transform_indices = @transform_3, window_bounds = array<i64: 1, 128>}, {transform_indices = @transform_4, window_bounds = array<i64: 1, 16, 128>}]} {
    %c0 = arith.constant 0 : index
    %c0_0 = arith.constant 0 : index
    %c0_1 = arith.constant 0 : index
    %0 = vector.load %arg1[%c0, %c0_0, %c0_1] : memref<1x16x128xf32, #tpu.memory_space<vmem>>, vector<1x16x128xf32>
    %1 = vector.shape_cast %0 : vector<1x16x128xf32> to vector<16x128xf32>
    %c0_2 = arith.constant 0 : index
    %c0_3 = arith.constant 0 : index
    %2 = vector.load %arg2[%c0_2, %c0_3] : memref<128x384xf32, #tpu.memory_space<vmem>>, vector<128x384xf32>
    %cst = arith.constant dense<0.000000e+00> : vector<16x384xf32>
    %3 = tpu.matmul %1, %2, %cst {dimension_numbers = #tpu.dot_dimension_numbers<[1], [0], [0], [1], [0, 0, 1, 1], [], []>} : vector<16x128xf32>, vector<128x384xf32>, vector<16x384xf32> -> vector<16x384xf32>
    %4 = vector.extract_strided_slice %3 {offsets = [0, 0], sizes = [16, 128], strides = [1, 1]} : vector<16x384xf32> to vector<16x128xf32>
    %5 = vector.extract_strided_slice %3 {offsets = [0, 128], sizes = [16, 128], strides = [1, 1]} : vector<16x384xf32> to vector<16x128xf32>
    %6 = vector.extract_strided_slice %3 {offsets = [0, 256], sizes = [16, 128], strides = [1, 1]} : vector<16x384xf32> to vector<16x128xf32>
    %7 = vector.shape_cast %4 : vector<16x128xf32> to vector<1x16x128xf32>
    %8 = vector.shape_cast %5 : vector<16x128xf32> to vector<1x16x128xf32>
    %9 = vector.shape_cast %6 : vector<16x128xf32> to vector<1x16x128xf32>
    %10 = vector.extract_strided_slice %7 {offsets = [0, 0, 0], sizes = [1, 16, 32], strides = [1, 1, 1]} : vector<1x16x128xf32> to vector<1x16x32xf32>
    %11 = vector.extract_strided_slice %8 {offsets = [0, 0, 0], sizes = [1, 16, 32], strides = [1, 1, 1]} : vector<1x16x128xf32> to vector<1x16x32xf32>
    %12 = vector.extract_strided_slice %9 {offsets = [0, 0, 0], sizes = [1, 16, 32], strides = [1, 1, 1]} : vector<1x16x128xf32> to vector<1x16x32xf32>
    "tpu.trace_start"() <{level = 10 : i32, message = "bnd,bsd->bns"}> : () -> ()
    %cst_4 = arith.constant dense<0.000000e+00> : vector<1x16x16xf32>
    %13 = tpu.matmul %10, %11, %cst_4 {dimension_numbers = #tpu.dot_dimension_numbers<[2], [2], [1], [1], [0, 0, 0, 1, 1, 1], [0], [0]>} : vector<1x16x32xf32>, vector<1x16x32xf32>, vector<1x16x16xf32> -> vector<1x16x16xf32>
    "tpu.trace_stop"() : () -> ()
    %cst_5 = arith.constant dense<0xFF800000> : vector<1x16xf32>
    %14 = vector.multi_reduction <maximumf>, %13, %cst_5 [2] : vector<1x16x16xf32> to vector<1x16xf32>
    %15 = vector.shape_cast %14 : vector<1x16xf32> to vector<1x16x1xf32>
    %16 = vector.broadcast %15 : vector<1x16x1xf32> to vector<1x16x16xf32>
    %17 = arith.subf %13, %16 : vector<1x16x16xf32>
    %18 = math.exp %17 : vector<1x16x16xf32>
    %cst_6 = arith.constant dense<0.000000e+00> : vector<1x16xf32>
    %19 = vector.multi_reduction <add>, %18, %cst_6 [2] : vector<1x16x16xf32> to vector<1x16xf32>
    %20 = vector.shape_cast %19 : vector<1x16xf32> to vector<1x16x1xf32>
    "tpu.trace_start"() <{level = 10 : i32, message = "bns,bsd->bnd"}> : () -> ()
    %cst_7 = arith.constant dense<0.000000e+00> : vector<1x16x32xf32>
    %21 = tpu.matmul %18, %12, %cst_7 {dimension_numbers = #tpu.dot_dimension_numbers<[2], [1], [1], [2], [0, 0, 0, 1, 1, 2], [0], [0]>} : vector<1x16x16xf32>, vector<1x16x32xf32>, vector<1x16x32xf32> -> vector<1x16x32xf32>
    "tpu.trace_stop"() : () -> ()
    %22 = tpu.reciprocal %20 : vector<1x16x1xf32> -> vector<1x16x1xf32>
    %23 = vector.broadcast %22 : vector<1x16x1xf32> to vector<1x16x32xf32>
    %24 = arith.mulf %21, %23 : vector<1x16x32xf32>
    %25 = vector.extract_strided_slice %7 {offsets = [0, 0, 32], sizes = [1, 16, 32], strides = [1, 1, 1]} : vector<1x16x128xf32> to vector<1x16x32xf32>
    %26 = vector.extract_strided_slice %8 {offsets = [0, 0, 32], sizes = [1, 16, 32], strides = [1, 1, 1]} : vector<1x16x128xf32> to vector<1x16x32xf32>
    %27 = vector.extract_strided_slice %9 {offsets = [0, 0, 32], sizes = [1, 16, 32], strides = [1, 1, 1]} : vector<1x16x128xf32> to vector<1x16x32xf32>
    "tpu.trace_start"() <{level = 10 : i32, message = "bnd,bsd->bns"}> : () -> ()
    %cst_8 = arith.constant dense<0.000000e+00> : vector<1x16x16xf32>
    %28 = tpu.matmul %25, %26, %cst_8 {dimension_numbers = #tpu.dot_dimension_numbers<[2], [2], [1], [1], [0, 0, 0, 1, 1, 1], [0], [0]>} : vector<1x16x32xf32>, vector<1x16x32xf32>, vector<1x16x16xf32> -> vector<1x16x16xf32>
    "tpu.trace_stop"() : () -> ()
    %cst_9 = arith.constant dense<0xFF800000> : vector<1x16xf32>
    %29 = vector.multi_reduction <maximumf>, %28, %cst_9 [2] : vector<1x16x16xf32> to vector<1x16xf32>
    %30 = vector.shape_cast %29 : vector<1x16xf32> to vector<1x16x1xf32>
    %31 = vector.broadcast %30 : vector<1x16x1xf32> to vector<1x16x16xf32>
    %32 = arith.subf %28, %31 : vector<1x16x16xf32>
    %33 = math.exp %32 : vector<1x16x16xf32>
    %cst_10 = arith.constant dense<0.000000e+00> : vector<1x16xf32>
    %34 = vector.multi_reduction <add>, %33, %cst_10 [2] : vector<1x16x16xf32> to vector<1x16xf32>
    %35 = vector.shape_cast %34 : vector<1x16xf32> to vector<1x16x1xf32>
    "tpu.trace_start"() <{level = 10 : i32, message = "bns,bsd->bnd"}> : () -> ()
    %cst_11 = arith.constant dense<0.000000e+00> : vector<1x16x32xf32>
    %36 = tpu.matmul %33, %27, %cst_11 {dimension_numbers = #tpu.dot_dimension_numbers<[2], [1], [1], [2], [0, 0, 0, 1, 1, 2], [0], [0]>} : vector<1x16x16xf32>, vector<1x16x32xf32>, vector<1x16x32xf32> -> vector<1x16x32xf32>
    "tpu.trace_stop"() : () -> ()
    %37 = tpu.reciprocal %35 : vector<1x16x1xf32> -> vector<1x16x1xf32>
    %38 = vector.broadcast %37 : vector<1x16x1xf32> to vector<1x16x32xf32>
    %39 = arith.mulf %36, %38 : vector<1x16x32xf32>
    %40 = vector.extract_strided_slice %7 {offsets = [0, 0, 64], sizes = [1, 16, 32], strides = [1, 1, 1]} : vector<1x16x128xf32> to vector<1x16x32xf32>
    %41 = vector.extract_strided_slice %8 {offsets = [0, 0, 64], sizes = [1, 16, 32], strides = [1, 1, 1]} : vector<1x16x128xf32> to vector<1x16x32xf32>
    %42 = vector.extract_strided_slice %9 {offsets = [0, 0, 64], sizes = [1, 16, 32], strides = [1, 1, 1]} : vector<1x16x128xf32> to vector<1x16x32xf32>
    "tpu.trace_start"() <{level = 10 : i32, message = "bnd,bsd->bns"}> : () -> ()
    %cst_12 = arith.constant dense<0.000000e+00> : vector<1x16x16xf32>
    %43 = tpu.matmul %40, %41, %cst_12 {dimension_numbers = #tpu.dot_dimension_numbers<[2], [2], [1], [1], [0, 0, 0, 1, 1, 1], [0], [0]>} : vector<1x16x32xf32>, vector<1x16x32xf32>, vector<1x16x16xf32> -> vector<1x16x16xf32>
    "tpu.trace_stop"() : () -> ()
    %cst_13 = arith.constant dense<0xFF800000> : vector<1x16xf32>
    %44 = vector.multi_reduction <maximumf>, %43, %cst_13 [2] : vector<1x16x16xf32> to vector<1x16xf32>
    %45 = vector.shape_cast %44 : vector<1x16xf32> to vector<1x16x1xf32>
    %46 = vector.broadcast %45 : vector<1x16x1xf32> to vector<1x16x16xf32>
    %47 = arith.subf %43, %46 : vector<1x16x16xf32>
    %48 = math.exp %47 : vector<1x16x16xf32>
    %cst_14 = arith.constant dense<0.000000e+00> : vector<1x16xf32>
    %49 = vector.multi_reduction <add>, %48, %cst_14 [2] : vector<1x16x16xf32> to vector<1x16xf32>
    %50 = vector.shape_cast %49 : vector<1x16xf32> to vector<1x16x1xf32>
    "tpu.trace_start"() <{level = 10 : i32, message = "bns,bsd->bnd"}> : () -> ()
    %cst_15 = arith.constant dense<0.000000e+00> : vector<1x16x32xf32>
    %51 = tpu.matmul %48, %42, %cst_15 {dimension_numbers = #tpu.dot_dimension_numbers<[2], [1], [1], [2], [0, 0, 0, 1, 1, 2], [0], [0]>} : vector<1x16x16xf32>, vector<1x16x32xf32>, vector<1x16x32xf32> -> vector<1x16x32xf32>
    "tpu.trace_stop"() : () -> ()
    %52 = tpu.reciprocal %50 : vector<1x16x1xf32> -> vector<1x16x1xf32>
    %53 = vector.broadcast %52 : vector<1x16x1xf32> to vector<1x16x32xf32>
    %54 = arith.mulf %51, %53 : vector<1x16x32xf32>
    %55 = vector.extract_strided_slice %7 {offsets = [0, 0, 96], sizes = [1, 16, 32], strides = [1, 1, 1]} : vector<1x16x128xf32> to vector<1x16x32xf32>
    %56 = vector.extract_strided_slice %8 {offsets = [0, 0, 96], sizes = [1, 16, 32], strides = [1, 1, 1]} : vector<1x16x128xf32> to vector<1x16x32xf32>
    %57 = vector.extract_strided_slice %9 {offsets = [0, 0, 96], sizes = [1, 16, 32], strides = [1, 1, 1]} : vector<1x16x128xf32> to vector<1x16x32xf32>
    "tpu.trace_start"() <{level = 10 : i32, message = "bnd,bsd->bns"}> : () -> ()
    %cst_16 = arith.constant dense<0.000000e+00> : vector<1x16x16xf32>
    %58 = tpu.matmul %55, %56, %cst_16 {dimension_numbers = #tpu.dot_dimension_numbers<[2], [2], [1], [1], [0, 0, 0, 1, 1, 1], [0], [0]>} : vector<1x16x32xf32>, vector<1x16x32xf32>, vector<1x16x16xf32> -> vector<1x16x16xf32>
    "tpu.trace_stop"() : () -> ()
    %cst_17 = arith.constant dense<0xFF800000> : vector<1x16xf32>
    %59 = vector.multi_reduction <maximumf>, %58, %cst_17 [2] : vector<1x16x16xf32> to vector<1x16xf32>
    %60 = vector.shape_cast %59 : vector<1x16xf32> to vector<1x16x1xf32>
    %61 = vector.broadcast %60 : vector<1x16x1xf32> to vector<1x16x16xf32>
    %62 = arith.subf %58, %61 : vector<1x16x16xf32>
    %63 = math.exp %62 : vector<1x16x16xf32>
    %cst_18 = arith.constant dense<0.000000e+00> : vector<1x16xf32>
    %64 = vector.multi_reduction <add>, %63, %cst_18 [2] : vector<1x16x16xf32> to vector<1x16xf32>
    %65 = vector.shape_cast %64 : vector<1x16xf32> to vector<1x16x1xf32>
    "tpu.trace_start"() <{level = 10 : i32, message = "bns,bsd->bnd"}> : () -> ()
    %cst_19 = arith.constant dense<0.000000e+00> : vector<1x16x32xf32>
    %66 = tpu.matmul %63, %57, %cst_19 {dimension_numbers = #tpu.dot_dimension_numbers<[2], [1], [1], [2], [0, 0, 0, 1, 1, 2], [0], [0]>} : vector<1x16x16xf32>, vector<1x16x32xf32>, vector<1x16x32xf32> -> vector<1x16x32xf32>
    "tpu.trace_stop"() : () -> ()
    %67 = tpu.reciprocal %65 : vector<1x16x1xf32> -> vector<1x16x1xf32>
    %68 = vector.broadcast %67 : vector<1x16x1xf32> to vector<1x16x32xf32>
    %69 = arith.mulf %66, %68 : vector<1x16x32xf32>
    %70 = tpu.concatenate %24, %39, %54, %69 in 2 : vector<1x16x32xf32>, vector<1x16x32xf32>, vector<1x16x32xf32>, vector<1x16x32xf32> -> vector<1x16x128xf32>
    %71 = vector.shape_cast %70 : vector<1x16x128xf32> to vector<16x128xf32>
    %c0_20 = arith.constant 0 : index
    %c0_21 = arith.constant 0 : index
    %72 = vector.load %arg3[%c0_20, %c0_21] : memref<128x128xf32, #tpu.memory_space<vmem>>, vector<128x128xf32>
    %cst_22 = arith.constant dense<0.000000e+00> : vector<16x128xf32>
    %73 = tpu.matmul %71, %72, %cst_22 {dimension_numbers = #tpu.dot_dimension_numbers<[1], [0], [0], [1], [0, 0, 1, 1], [], []>} : vector<16x128xf32>, vector<128x128xf32>, vector<16x128xf32> -> vector<16x128xf32>
    %c0_23 = arith.constant 0 : index
    %c0_24 = arith.constant 0 : index
    %74 = vector.load %arg4[%c0_23, %c0_24] : memref<1x128xf32, #tpu.memory_space<vmem>>, vector<1x128xf32>
    %75 = vector.broadcast %74 : vector<1x128xf32> to vector<16x128xf32>
    %76 = arith.addf %73, %75 : vector<16x128xf32>
    %77 = vector.shape_cast %76 : vector<16x128xf32> to vector<1x16x128xf32>
    %c0_25 = arith.constant 0 : index
    %c0_26 = arith.constant 0 : index
    %c0_27 = arith.constant 0 : index
    %78 = vector.load %arg5[%c0_25, %c0_26, %c0_27] : memref<1x16x128xf32, #tpu.memory_space<vmem>>, vector<1x16x128xf32>
    tpu.vector_store %arg5[%c0_25, %c0_26, %c0_27], %77 {strides = array<i32>} : memref<1x16x128xf32, #tpu.memory_space<vmem>>, vector<1x16x128xf32>,
    return
  }
  func.func @transform_0(%arg0: i32) -> (i32, i32, i32) {
    %c0_i32 = arith.constant 0 : i32
    %c0_i32_0 = arith.constant 0 : i32
    %c0_i32_1 = arith.constant 0 : i32
    return %arg0, %c0_i32, %c0_i32_0 : i32, i32, i32
  }
  func.func @transform_1(%arg0: i32) -> (i32, i32) {
    %c0_i32 = arith.constant 0 : i32
    %c0_i32_0 = arith.constant 0 : i32
    %c0_i32_1 = arith.constant 0 : i32
    return %c0_i32, %c0_i32_0 : i32, i32
  }
  func.func @transform_2(%arg0: i32) -> (i32, i32) {
    %c0_i32 = arith.constant 0 : i32
    %c0_i32_0 = arith.constant 0 : i32
    %c0_i32_1 = arith.constant 0 : i32
    return %c0_i32, %c0_i32_0 : i32, i32
  }
  func.func @transform_3(%arg0: i32) -> (i32, i32) {
    %c0_i32 = arith.constant 0 : i32
    %c0_i32_0 = arith.constant 0 : i32
    %c0_i32_1 = arith.constant 0 : i32
    return %c0_i32, %c0_i32_0 : i32, i32
  }
  func.func @transform_4(%arg0: i32) -> (i32, i32, i32) {
    %c0_i32 = arith.constant 0 : i32
    %c0_i32_0 = arith.constant 0 : i32
    %c0_i32_1 = arith.constant 0 : i32
    return %arg0, %c0_i32, %c0_i32_0 : i32, i32, i32
  }
}

module attributes {stable_mosaic.version = 11 : i64} {
  func.func @_mha_self_kernel(%arg0: i32, %arg1: memref<1x16x128xf32, #tpu.memory_space<vmem>>, %arg2: memref<128x384xf32, #tpu.memory_space<vmem>>, %arg3: memref<128x128xf32, #tpu.memory_space<vmem>>, %arg4: memref<1x128xf32, #tpu.memory_space<vmem>>, %arg5: memref<1x16x128xf32, #tpu.memory_space<vmem>>) attributes {dimension_semantics = [#tpu.dimension_semantics<parallel>], iteration_bounds = array<i64: 2>, scalar_prefetch = 0 : i64, scratch_operands = 0 : i64, tpu.core_type = #tpu.core_type<tc>, window_params = [{transform_indices = @transform_0, window_bounds = array<i64: 1, 16, 128>}, {pipeline_mode = #tpu.pipeline_mode<synchronous>, transform_indices = @transform_1, window_bounds = array<i64: 128, 384>}, {pipeline_mode = #tpu.pipeline_mode<synchronous>, transform_indices = @transform_2, window_bounds = array<i64: 128, 128>}, {pipeline_mode = #tpu.pipeline_mode<synchronous>, transform_indices = @transform_3, window_bounds = array<i64: 1, 128>}, {transform_indices = @transform_4, window_bounds = array<i64: 1, 16, 128>}]} {
    %c0 = arith.constant 0 : index
    %c0_0 = arith.constant 0 : index
    %c0_1 = arith.constant 0 : index
    %0 = vector.load %arg1[%c0, %c0_0, %c0_1] : memref<1x16x128xf32, #tpu.memory_space<vmem>>, vector<1x16x128xf32>
    %1 = vector.shape_cast %0 : vector<1x16x128xf32> to vector<16x128xf32>
    %c0_2 = arith.constant 0 : index
    %c0_3 = arith.constant 0 : index
    %2 = vector.load %arg2[%c0_2, %c0_3] : memref<128x384xf32, #tpu.memory_space<vmem>>, vector<128x384xf32>
    %cst = arith.constant dense<0.000000e+00> : vector<16x384xf32>
    %3 = tpu.matmul %1, %2, %cst {dimension_numbers = #tpu.dot_dimension_numbers<[1], [0], [0], [1], [0, 0, 1, 1], [], []>} : vector<16x128xf32>, vector<128x384xf32>, vector<16x384xf32> -> vector<16x384xf32>
    %4 = vector.extract_strided_slice %3 {offsets = [0, 0], sizes = [16, 128], strides = [1, 1]} : vector<16x384xf32> to vector<16x128xf32>
    %5 = vector.extract_strided_slice %3 {offsets = [0, 128], sizes = [16, 128], strides = [1, 1]} : vector<16x384xf32> to vector<16x128xf32>
    %6 = vector.extract_strided_slice %3 {offsets = [0, 256], sizes = [16, 128], strides = [1, 1]} : vector<16x384xf32> to vector<16x128xf32>
    %7 = vector.shape_cast %4 : vector<16x128xf32> to vector<1x16x128xf32>
    %8 = vector.shape_cast %5 : vector<16x128xf32> to vector<1x16x128xf32>
    %9 = vector.shape_cast %6 : vector<16x128xf32> to vector<1x16x128xf32>
    %10 = vector.extract_strided_slice %7 {offsets = [0, 0, 0], sizes = [1, 16, 32], strides = [1, 1, 1]} : vector<1x16x128xf32> to vector<1x16x32xf32>
    %11 = vector.extract_strided_slice %8 {offsets = [0, 0, 0], sizes = [1, 16, 32], strides = [1, 1, 1]} : vector<1x16x128xf32> to vector<1x16x32xf32>
    %12 = vector.extract_strided_slice %9 {offsets = [0, 0, 0], sizes = [1, 16, 32], strides = [1, 1, 1]} : vector<1x16x128xf32> to vector<1x16x32xf32>
    "tpu.trace_start"() <{level = 10 : i32, message = "bnd,bsd->bns"}> : () -> ()
    %cst_4 = arith.constant dense<0.000000e+00> : vector<1x16x16xf32>
    %13 = tpu.matmul %10, %11, %cst_4 {dimension_numbers = #tpu.dot_dimension_numbers<[2], [2], [1], [1], [0, 0, 0, 1, 1, 1], [0], [0]>} : vector<1x16x32xf32>, vector<1x16x32xf32>, vector<1x16x16xf32> -> vector<1x16x16xf32>
    "tpu.trace_stop"() : () -> ()
    %cst_5 = arith.constant dense<0xFF800000> : vector<1x16xf32>
    %14 = vector.multi_reduction <maximumf>, %13, %cst_5 [2] : vector<1x16x16xf32> to vector<1x16xf32>
    %15 = vector.shape_cast %14 : vector<1x16xf32> to vector<1x16x1xf32>
    %16 = vector.broadcast %15 : vector<1x16x1xf32> to vector<1x16x16xf32>
    %17 = arith.subf %13, %16 : vector<1x16x16xf32>
    %18 = math.exp %17 : vector<1x16x16xf32>
    %cst_6 = arith.constant dense<0.000000e+00> : vector<1x16xf32>
    %19 = vector.multi_reduction <add>, %18, %cst_6 [2] : vector<1x16x16xf32> to vector<1x16xf32>
    %20 = vector.shape_cast %19 : vector<1x16xf32> to vector<1x16x1xf32>
    "tpu.trace_start"() <{level = 10 : i32, message = "bns,bsd->bnd"}> : () -> ()
    %cst_7 = arith.constant dense<0.000000e+00> : vector<1x16x32xf32>
    %21 = tpu.matmul %18, %12, %cst_7 {dimension_numbers = #tpu.dot_dimension_numbers<[2], [1], [1], [2], [0, 0, 0, 1, 1, 2], [0], [0]>} : vector<1x16x16xf32>, vector<1x16x32xf32>, vector<1x16x32xf32> -> vector<1x16x32xf32>
    "tpu.trace_stop"() : () -> ()
    %22 = tpu.reciprocal %20 : vector<1x16x1xf32> -> vector<1x16x1xf32>
    %23 = vector.broadcast %22 : vector<1x16x1xf32> to vector<1x16x32xf32>
    %24 = arith.mulf %21, %23 : vector<1x16x32xf32>
    %25 = vector.extract_strided_slice %7 {offsets = [0, 0, 32], sizes = [1, 16, 32], strides = [1, 1, 1]} : vector<1x16x128xf32> to vector<1x16x32xf32>
    %26 = vector.extract_strided_slice %8 {offsets = [0, 0, 32], sizes = [1, 16, 32], strides = [1, 1, 1]} : vector<1x16x128xf32> to vector<1x16x32xf32>
    %27 = vector.extract_strided_slice %9 {offsets = [0, 0, 32], sizes = [1, 16, 32], strides = [1, 1, 1]} : vector<1x16x128xf32> to vector<1x16x32xf32>
    "tpu.trace_start"() <{level = 10 : i32, message = "bnd,bsd->bns"}> : () -> ()
    %cst_8 = arith.constant dense<0.000000e+00> : vector<1x16x16xf32>
    %28 = tpu.matmul %25, %26, %cst_8 {dimension_numbers = #tpu.dot_dimension_numbers<[2], [2], [1], [1], [0, 0, 0, 1, 1, 1], [0], [0]>} : vector<1x16x32xf32>, vector<1x16x32xf32>, vector<1x16x16xf32> -> vector<1x16x16xf32>
    "tpu.trace_stop"() : () -> ()
    %cst_9 = arith.constant dense<0xFF800000> : vector<1x16xf32>
    %29 = vector.multi_reduction <maximumf>, %28, %cst_9 [2] : vector<1x16x16xf32> to vector<1x16xf32>
    %30 = vector.shape_cast %29 : vector<1x16xf32> to vector<1x16x1xf32>
    %31 = vector.broadcast %30 : vector<1x16x1xf32> to vector<1x16x16xf32>
    %32 = arith.subf %28, %31 : vector<1x16x16xf32>
    %33 = math.exp %32 : vector<1x16x16xf32>
    %cst_10 = arith.constant dense<0.000000e+00> : vector<1x16xf32>
    %34 = vector.multi_reduction <add>, %33, %cst_10 [2] : vector<1x16x16xf32> to vector<1x16xf32>
    %35 = vector.shape_cast %34 : vector<1x16xf32> to vector<1x16x1xf32>
    "tpu.trace_start"() <{level = 10 : i32, message = "bns,bsd->bnd"}> : () -> ()
    %cst_11 = arith.constant dense<0.000000e+00> : vector<1x16x32xf32>
    %36 = tpu.matmul %33, %27, %cst_11 {dimension_numbers = #tpu.dot_dimension_numbers<[2], [1], [1], [2], [0, 0, 0, 1, 1, 2], [0], [0]>} : vector<1x16x16xf32>, vector<1x16x32xf32>, vector<1x16x32xf32> -> vector<1x16x32xf32>
    "tpu.trace_stop"() : () -> ()
    %37 = tpu.reciprocal %35 : vector<1x16x1xf32> -> vector<1x16x1xf32>
    %38 = vector.broadcast %37 : vector<1x16x1xf32> to vector<1x16x32xf32>
    %39 = arith.mulf %36, %38 : vector<1x16x32xf32>
    %40 = vector.extract_strided_slice %7 {offsets = [0, 0, 64], sizes = [1, 16, 32], strides = [1, 1, 1]} : vector<1x16x128xf32> to vector<1x16x32xf32>
    %41 = vector.extract_strided_slice %8 {offsets = [0, 0, 64], sizes = [1, 16, 32], strides = [1, 1, 1]} : vector<1x16x128xf32> to vector<1x16x32xf32>
    %42 = vector.extract_strided_slice %9 {offsets = [0, 0, 64], sizes = [1, 16, 32], strides = [1, 1, 1]} : vector<1x16x128xf32> to vector<1x16x32xf32>
    "tpu.trace_start"() <{level = 10 : i32, message = "bnd,bsd->bns"}> : () -> ()
    %cst_12 = arith.constant dense<0.000000e+00> : vector<1x16x16xf32>
    %43 = tpu.matmul %40, %41, %cst_12 {dimension_numbers = #tpu.dot_dimension_numbers<[2], [2], [1], [1], [0, 0, 0, 1, 1, 1], [0], [0]>} : vector<1x16x32xf32>, vector<1x16x32xf32>, vector<1x16x16xf32> -> vector<1x16x16xf32>
    "tpu.trace_stop"() : () -> ()
    %cst_13 = arith.constant dense<0xFF800000> : vector<1x16xf32>
    %44 = vector.multi_reduction <maximumf>, %43, %cst_13 [2] : vector<1x16x16xf32> to vector<1x16xf32>
    %45 = vector.shape_cast %44 : vector<1x16xf32> to vector<1x16x1xf32>
    %46 = vector.broadcast %45 : vector<1x16x1xf32> to vector<1x16x16xf32>
    %47 = arith.subf %43, %46 : vector<1x16x16xf32>
    %48 = math.exp %47 : vector<1x16x16xf32>
    %cst_14 = arith.constant dense<0.000000e+00> : vector<1x16xf32>
    %49 = vector.multi_reduction <add>, %48, %cst_14 [2] : vector<1x16x16xf32> to vector<1x16xf32>
    %50 = vector.shape_cast %49 : vector<1x16xf32> to vector<1x16x1xf32>
    "tpu.trace_start"() <{level = 10 : i32, message = "bns,bsd->bnd"}> : () -> ()
    %cst_15 = arith.constant dense<0.000000e+00> : vector<1x16x32xf32>
    %51 = tpu.matmul %48, %42, %cst_15 {dimension_numbers = #tpu.dot_dimension_numbers<[2], [1], [1], [2], [0, 0, 0, 1, 1, 2], [0], [0]>} : vector<1x16x16xf32>, vector<1x16x32xf32>, vector<1x16x32xf32> -> vector<1x16x32xf32>
    "tpu.trace_stop"() : () -> ()
    %52 = tpu.reciprocal %50 : vector<1x16x1xf32> -> vector<1x16x1xf32>
    %53 = vector.broadcast %52 : vector<1x16x1xf32> to vector<1x16x32xf32>
    %54 = arith.mulf %51, %53 : vector<1x16x32xf32>
    %55 = vector.extract_strided_slice %7 {offsets = [0, 0, 96], sizes = [1, 16, 32], strides = [1, 1, 1]} : vector<1x16x128xf32> to vector<1x16x32xf32>
    %56 = vector.extract_strided_slice %8 {offsets = [0, 0, 96], sizes = [1, 16, 32], strides = [1, 1, 1]} : vector<1x16x128xf32> to vector<1x16x32xf32>
    %57 = vector.extract_strided_slice %9 {offsets = [0, 0, 96], sizes = [1, 16, 32], strides = [1, 1, 1]} : vector<1x16x128xf32> to vector<1x16x32xf32>
    "tpu.trace_start"() <{level = 10 : i32, message = "bnd,bsd->bns"}> : () -> ()
    %cst_16 = arith.constant dense<0.000000e+00> : vector<1x16x16xf32>
    %58 = tpu.matmul %55, %56, %cst_16 {dimension_numbers = #tpu.dot_dimension_numbers<[2], [2], [1], [1], [0, 0, 0, 1, 1, 1], [0], [0]>} : vector<1x16x32xf32>, vector<1x16x32xf32>, vector<1x16x16xf32> -> vector<1x16x16xf32>
    "tpu.trace_stop"() : () -> ()
    %cst_17 = arith.constant dense<0xFF800000> : vector<1x16xf32>
    %59 = vector.multi_reduction <maximumf>, %58, %cst_17 [2] : vector<1x16x16xf32> to vector<1x16xf32>
    %60 = vector.shape_cast %59 : vector<1x16xf32> to vector<1x16x1xf32>
    %61 = vector.broadcast %60 : vector<1x16x1xf32> to vector<1x16x16xf32>
    %62 = arith.subf %58, %61 : vector<1x16x16xf32>
    %63 = math.exp %62 : vector<1x16x16xf32>
    %cst_18 = arith.constant dense<0.000000e+00> : vector<1x16xf32>
    %64 = vector.multi_reduction <add>, %63, %cst_18 [2] : vector<1x16x16xf32> to vector<1x16xf32>
    %65 = vector.shape_cast %64 : vector<1x16xf32> to vector<1x16x1xf32>
    "tpu.trace_start"() <{level = 10 : i32, message = "bns,bsd->bnd"}> : () -> ()
    %cst_19 = arith.constant dense<0.000000e+00> : vector<1x16x32xf32>
    %66 = tpu.matmul %63, %57, %cst_19 {dimension_numbers = #tpu.dot_dimension_numbers<[2], [1], [1], [2], [0, 0, 0, 1, 1, 2], [0], [0]>} : vector<1x16x16xf32>, vector<1x16x32xf32>, vector<1x16x32xf32> -> vector<1x16x32xf32>
    "tpu.trace_stop"() : () -> ()
    %67 = tpu.reciprocal %65 : vector<1x16x1xf32> -> vector<1x16x1xf32>
    %68 = vector.broadcast %67 : vector<1x16x1xf32> to vector<1x16x32xf32>
    %69 = arith.mulf %66, %68 : vector<1x16x32xf32>
    %70 = tpu.concatenate %24, %39, %54, %69 in 2 : vector<1x16x32xf32>, vector<1x16x32xf32>, vector<1x16x32xf32>, vector<1x16x32xf32> -> vector<1x16x128xf32>
    %71 = vector.shape_cast %70 : vector<1x16x128xf32> to vector<16x128xf32>
    %c0_20 = arith.constant 0 : index
    %c0_21 = arith.constant 0 : index
    %72 = vector.load %arg3[%c0_20, %c0_21] : memref<128x128xf32, #tpu.memory_space<vmem>>, vector<128x128xf32>
    %cst_22 = arith.constant dense<0.000000e+00> : vector<16x128xf32>
    %73 = tpu.matmul %71, %72, %cst_22 {dimension_numbers = #tpu.dot_dimension_numbers<[1], [0], [0], [1], [0, 0, 1, 1], [], []>} : vector<16x128xf32>, vector<128x128xf32>, vector<16x128xf32> -> vector<16x128xf32>
    %c0_23 = arith.constant 0 : index
    %c0_24 = arith.constant 0 : index
    %74 = vector.load %arg4[%c0_23, %c0_24] : memref<1x128xf32, #tpu.memory_space<vmem>>, vector<1x128xf32>
    %75 = vector.broadcast %74 : vector<1x128xf32> to vector<16x128xf32>
    %76 = arith.addf %73, %75 : vector<16x128xf32>
    %77 = vector.shape_cast %76 : vector<16x128xf32> to vector<1x16x128xf32>
    %c0_25 = arith.constant 0 : index
    %c0_26 = arith.constant 0 : index
    %c0_27 = arith.constant 0 : index
    %78 = vector.load %arg5[%c0_25, %c0_26, %c0_27] : memref<1x16x128xf32, #tpu.memory_space<vmem>>, vector<1x16x128xf32>
    tpu.vector_store %arg5[%c0_25, %c0_26, %c0_27], %77 {strides = array<i32>} : memref<1x16x128xf32, #tpu.memory_space<vmem>>, vector<1x16x128xf32>,
    return
  }
  func.func @transform_0(%arg0: i32) -> (i32, i32, i32) {
    %c0_i32 = arith.constant 0 : i32
    %c0_i32_0 = arith.constant 0 : i32
    %c0_i32_1 = arith.constant 0 : i32
    return %arg0, %c0_i32, %c0_i32_0 : i32, i32, i32
  }
  func.func @transform_1(%arg0: i32) -> (i32, i32) {
    %c0_i32 = arith.constant 0 : i32
    %c0_i32_0 = arith.constant 0 : i32
    %c0_i32_1 = arith.constant 0 : i32
    return %c0_i32, %c0_i32_0 : i32, i32
  }
  func.func @transform_2(%arg0: i32) -> (i32, i32) {
    %c0_i32 = arith.constant 0 : i32
    %c0_i32_0 = arith.constant 0 : i32
    %c0_i32_1 = arith.constant 0 : i32
    return %c0_i32, %c0_i32_0 : i32, i32
  }
  func.func @transform_3(%arg0: i32) -> (i32, i32) {
    %c0_i32 = arith.constant 0 : i32
    %c0_i32_0 = arith.constant 0 : i32
    %c0_i32_1 = arith.constant 0 : i32
    return %c0_i32, %c0_i32_0 : i32, i32
  }
  func.func @transform_4(%arg0: i32) -> (i32, i32, i32) {
    %c0_i32 = arith.constant 0 : i32
    %c0_i32_0 = arith.constant 0 : i32
    %c0_i32_1 = arith.constant 0 : i32
    return %arg0, %c0_i32, %c0_i32_0 : i32, i32, i32
  }
}

</mosaic_0001>

<bundles_post_ra>
// kernel: tpu_custom_call.1
= control target key start
LH: loop header
LB: loop body
LE: loop exit
PB: predicated region body
PF: predicated region fallthrough
CT: control target
= control target key end

     0   :  { %9 = vsyncpa [#allocation3], 0  ;;  %s2575_s0 = inlined_call_operand.hbm [shape: f32[2,16,128], index: 0, kind: input, shape index: {}]   ;;  %s2576_s1 = inlined_call_operand.hbm [shape: f32[128,384], index: 1, kind: input, shape index: {}]   ;;  %s2577_s2 = inlined_call_operand.hbm [shape: f32[128,128], index: 2, kind: input, shape index: {}]   ;;  %s2578_s3 = inlined_call_operand.vmem [shape: f32[1,128], index: 3, kind: input, shape index: {}]   ;;  %s2579_s4 = inlined_call_operand.hbm [shape: f32[2,16,128], index: 4, kind: output, shape index: {}]  }
   0x1   :  { %11 = vsyncpa [#allocation3 + $0x1], 0 }
   0x2   :  { %12 = vsyncpa [#allocation6], 0 }
   0x3   :  { %13 = vsyncpa [#allocation4], 0 }
   0x4   :  { %15 = vsyncpa [#allocation4 + $0x1], 0  ;;  %s2205_s15 = smov 0   ;;  %s2207_s16 = smov 0  }
   0x5   :  { %s2209_s17 = smov 0   ;;  %s2211_s18 = smov 0  }
   0x6 LB: > { %s2226_s19 = sadd.s32 4294967295, %s2164_s18   ;;  %s1479_s20 = sadd.s32 4294967294, %s2164_s18   ;;  %s2164_s18 = sphi %s2211_s18, %s2601_s18   ;;  %s2160_s17 = sphi %s2209_s17, %s2600_s17   ;;  %s2156_s16 = sphi %s2207_s16, %s2599_s16   ;;  %s2152_s15 = sphi %s2205_s15, %s2598_s15  }
   0x7   : > { %p41_p0 = scmp.ne.s32.totalorder %s2156_s16, %s2152_s15  ;;  %p2580_p1 = scmp.eq.s32.totalorder %s2226_s19, 0 }
   0x8   : > { %p134_p3 = scmp.eq.s32.totalorder %s1479_s20, 1  ;;  %p1480_p5 = scmp.ge.s32.totalorder %s2164_s18, 1 }
   0x9   : > { %p2235_p4 = por %p2580_p1, %p41_p0  ;;  %p141_p7 = scmp.lt.s32.totalorder %s2164_s18, 3 }
   0xa   : > { %p2240_p6 = por %p134_p3, %p41_p0  ;;  %s2166_s24 = smov [#allocation5]  }
   0xb   : > { %s2583_s21 = scalar_select %p2235_p4, 1, 0 }
   0xc   : > { %s2584_s22 = scalar_select %p2240_p6, 1, 0 }
   0xd   : > { %p2245_p8 = pnand %p1480_p5, %p141_p7  ;;  %s153_s25 = sshll.u32 %s2166_s24, 4  ;;  %s2249_s25 = int_to_ptr.vmem [resolvable:$true] %s153_s25 }
   0xe   : > { %s2167_s27 = smov [#allocation7]   ;;  %s2008_s5 = scalar_lea.hbm %s2576_s1, 6144 }
   0xf   : > { %p1866_p9 = pneg %p2245_p8  ;;  %s166_s28 = sshll.u32 %s2167_s27, 4  ;;  %s2260_s28 = int_to_ptr.vmem [resolvable:$true] %s166_s28 }
  0x10   : > { %p2009_p12 = scmp.ne.s32.totalorder %s2576_s1, %s2008_s5  ;;  %p2015_p5 = scmp.lt.u32.totalorder %s2008_s5, %s2576_s1 }
  0x11   : > { %p2256_p11 = pnand %p1866_p9, %p2580_p1 }
  0x13   : > { %p2010_p13 = pneg %p2256_p11 }
  0x15   : > { %p2011_p0 = pnand %p2010_p13, %p2009_p12 }
  0x17   : > { %p2012_p3 = pneg %p2011_p0 }
  0x19   : > { %p2017_p7 = pnand %p2015_p5, %p2012_p3 }
  0x1b   : > { %2020 = shalt.err (!%p2017_p7)
}
  0x1c   : > { %s2021_s10 = scalar_lea.vmem %s2249_s25, 6144  ;;  %p2029_p2 = scmp.lt.s32.totalorder %s2249_s25, %s2249_s25 }
  0x1d   : > { %p2022_p9 = scmp.ne.s32.totalorder %s2249_s25, %s2021_s10  ;;  %p2030_p12 = scmp.lt.s32.totalorder %s2021_s10, %s2021_s10 }
  0x1f   : > { %p2024_p10 = pnand %p2022_p9, %p2010_p13  ;;  %p2031_p0 = por %p2030_p12, %p2029_p2 }
  0x21   : > { %p2025_p1 = pneg %p2024_p10 }
  0x23   : > { %p2032_p6 = pnand %p2031_p0, %p2025_p1 }
  0x25   : > { %2035 = shalt.err (!%p2032_p6)
}
  0x26   : > { %s2168_s11 = smov 384   ;;  %s2169_s12 = smov 24  }
  0x27   : > { %1869 = dma.hbm_to_vmem [thread:$0]  (!%p2256_p11), %s2576_s1, 6144, %s2249_s25, [#allocation6], %s2168_s11, %s2168_s11, %s2169_s12  }
  0x28   : > { %s2036_s27 = scalar_lea.hbm %s2577_s2, 2048 }
  0x29   : > { %p2037_p2 = scmp.ne.s32.totalorder %s2577_s2, %s2036_s27  ;;  %p2043_p10 = scmp.lt.u32.totalorder %s2036_s27, %s2577_s2 }
  0x2b   : > { %p2039_p1 = pnand %p2037_p2, %p2010_p13 }
  0x2d   : > { %p2040_p6 = pneg %p2039_p1 }
  0x2f   : > { %p2045_p3 = pnand %p2043_p10, %p2040_p6 }
  0x31   : > { %2048 = shalt.err (!%p2045_p3)
}
  0x32   : > { %s2049_s25 = scalar_lea.vmem %s2260_s28, 2048  ;;  %p2057_p12 = scmp.lt.s32.totalorder %s2260_s28, %s2260_s28 }
  0x33   : > { %p2050_p5 = scmp.ne.s32.totalorder %s2260_s28, %s2049_s25  ;;  %p2058_p0 = scmp.lt.s32.totalorder %s2049_s25, %s2049_s25 }
  0x35   : > { %p2052_p7 = pnand %p2050_p5, %p2010_p13  ;;  %p2059_p2 = por %p2058_p0, %p2057_p12 }
  0x37   : > { %p2053_p9 = pneg %p2052_p7 }
  0x39   : > { %p2060_p1 = pnand %p2059_p2, %p2053_p9 }
  0x3b   : > { %2063 = shalt.err (!%p2060_p1)
}
  0x3c   : > { %s2170_s7 = smov 128   ;;  %s2171_s8 = smov 8  }
  0x3d   : > { %1872 = dma.hbm_to_vmem [thread:$0]  (!%p2256_p11), %s2577_s2, 2048, %s2260_s28, [#allocation6], %s2170_s7, %s2170_s7, %s2171_s8  }
  0x3e   : > { %s2318_s11 = sadd.s32 1, %s2164_s18   ;;  %s28_s13 = sadd.s32 1, %s2160_s17 }
  0x3f   : > { %s25_s12 = ssub.s32 %s2164_s18, %s2318_s11  ;;  %p35_p6 = scmp.ne.s32.totalorder %s2160_s17, %s2156_s16 }
  0x40   : > { %p26_p13 = scmp.eq.s32.totalorder %s25_s12, 0  ;;  %p36_p10 = scmp.eq.s32.totalorder %s2164_s18, 0 }
  0x41   : > { %p2587_p5 = scmp.eq.s32.totalorder %s2226_s19, 1  ;;  %p1883_p9 = scmp.lt.s32.totalorder %s2164_s18, 2 }
  0x42   : > { %s2327_s14 = scalar_select %p26_p13, %s2160_s17, %s28_s13  }
  0x43   : > { %p37_p3 = por %p36_p10, %p35_p6  ;;  %p2331_p7 = por %p2587_p5, %p35_p6 }
  0x44   : > { %s183_s20 = sand.u32 1, %s2160_s17   ;;  %s1522_s28 = sshll.u32 %s2164_s18, 8 }
  0x45   : > { %s2588_s26 = scalar_select %p2331_p7, 1, 0 }
  0x46   : > { %s1484_s24 = sshll.u32 %s183_s20, 4  ;;  %s2341_s30 = scalar_lea.hbm %s2575_s0, %s1522_s28 }
  0x47   : > { %s187_s5 = scalar_lea.vmem [#allocation2], %s1484_s24  ;;  %p2345_p11 = pnand %p1883_p9, %p37_p3 }
  0x48   : > { %s194_s6 = sshll.u32 %s187_s5, 4  ;;  %s2349_s9 = scalar_lea.sflag [#allocation3], %s183_s20  ;;  %s2343_s6 = int_to_ptr.vmem [resolvable:$true] %s194_s6 }
  0x49   : > { %s2064_s10 = scalar_lea.hbm %s2341_s30, 256  ;;  %p2066_p0 = pneg %p2345_p11 }
  0x4a   : > { %p2065_p12 = scmp.ne.s32.totalorder %s2341_s30, %s2064_s10  ;;  %s2069_s24 = scalar_lea.hbm %s2575_s0, 512 }
  0x4b   : > { %p2070_p13 = scmp.lt.u32.totalorder %s2341_s30, %s2575_s0  ;;  %p2071_p6 = scmp.lt.u32.totalorder %s2069_s24, %s2064_s10 }
  0x4c   : > { %p2067_p2 = pnand %p2066_p0, %p2065_p12  ;;  %p2073_p3 = scmp.lt.u32.totalorder %s2064_s10, %s2341_s30 }
  0x4d   : > { %p2072_p10 = por %p2071_p6, %p2070_p13 }
  0x4e   : > { %p2068_p1 = pneg %p2067_p2 }
  0x4f   : > { %p2074_p5 = por %p2073_p3, %p2072_p10 }
  0x51   : > { %p2075_p9 = pnand %p2074_p5, %p2068_p1 }
  0x53   : > { %2078 = shalt.err (!%p2075_p9)
}
  0x54   : > { %s2079_s20 = scalar_lea.vmem %s2343_s6, 256  ;;  %s2172_s29 = smov [#allocation2]  }
  0x55   : > { %p2080_p12 = scmp.ne.s32.totalorder %s2343_s6, %s2079_s20  ;;  %s2084_s5 = sshll.u32 %s2172_s29, 4  ;;  %s2085_s5 = int_to_ptr.vmem [resolvable:$false] %s2084_s5 }
  0x56   : > { %s2086_s12 = scalar_lea.vmem %s2085_s5, 512  ;;  %p2087_p4 = scmp.lt.s32.totalorder %s2343_s6, %s2085_s5 }
  0x57   : > { %p2082_p2 = pnand %p2080_p12, %p2066_p0  ;;  %p2088_p13 = scmp.lt.s32.totalorder %s2086_s12, %s2079_s20 }
  0x59   : > { %p2083_p7 = pneg %p2082_p2  ;;  %p2089_p6 = por %p2088_p13, %p2087_p4 }
  0x5b   : > { %p2090_p10 = pnand %p2089_p6, %p2083_p7 }
  0x5d   : > { %2093 = shalt.err (!%p2090_p10)
}
  0x5e   : > { %1876 = dma.hbm_to_vmem [thread:$0]  (!%p2345_p11), %s2341_s30, 256, %s2343_s6, %s2349_s9, %s2170_s7, %s2170_s7, %s2171_s8  }
  0x5f   : > { %206 = sbr.rel (%p2245_p8) target bundleno = 2077 (0x81d), region = 36  ;;  %s2383_s10 = sand.u32 (!%p2245_p8), 1, %s2156_s16  }
  0x60   : > { %s1488_s13 = sshll.u32 (!%p2245_p8), %s2383_s10, 4  ;;  %s209_s24 = scalar_lea.sflag (!%p2245_p8), [#allocation3], %s2383_s10 }
  0x61   : > { %s2389_s25 = scalar_lea.vmem (!%p2245_p8), [#allocation2], %s1488_s13  ;;  %p2590_p4 = scmp.ne.s32.totalorder (!%p2245_p8), %s2583_s21, 0 }
  0x66   : > { %2139 = dma.done.wait (%p2590_p4), %s209_s24, 256  }
  0x67   : > { %2141 = vsyncadd (%p2590_p4), %s209_s24, 4294967040  ;;  %p2591_p7 = scmp.eq.s32.totalorder %s2226_s19, 0 }
  0x69   : > { %2143 = dma.done.wait (%p2591_p7), [#allocation6], 8192   ;;  %p2592_p8 = pmov %p2591_p7 }
  0x6a   : > { %v2173_v0 = vmov 0.0   ;;  %v248_v1 = vld [vmem:[#allocation5 + $0x8] sm:$0xff]  ;;  %v251_v2 = vld [vmem:[#allocation5 + $0x20] sm:$0xff]  ;;  %v250_v5 = vld [vmem:[#allocation5 + $0x18] sm:$0xff]  ;;  %vm447_vm0 = vcmask 261120   ;;  %s2174_s21 = smov 96  }
  0x6b   : > { %2145 = vsyncadd (%p2592_p8), [#allocation6], 4294959104  ;;  %359 = vmatprep.mubr.f32.mxu0 %v2173_v0  ;;  %v247_v3 = vld [vmem:[#allocation5] sm:$0xff]  ;;  %v1718_v4 = vpack.c.bf16 %v251_v2, %v248_v1  ;;  %v254_v6 = vld [vmem:[#allocation5 + $0x38] sm:$0xff]  ;;  %s2175_s23 = smov 64   ;;  %vm535_vm2 = vcmask 130048  }
  0x6c   : > { %v257_v7 = vld [vmem:[#allocation5 + $0x50] sm:$0xff]  ;;  %v1720_v8 = vpack.c.bf16 %v250_v5, %v247_v3  ;;  %v256_v11 = vld [vmem:[#allocation5 + $0x48] sm:$0xff]  ;;  %v263_v13 = vld [vmem:[#allocation5 + $0x80] sm:$0xff]  ;;  %s2176_s7 = smov 32   ;;  %vm1267_vm3 = vcmask 523264   ;;  %vm1270_vm4 = vcmask 785408  }
  0x6d   : > { %v1722_v9 = vpack.c.bf16 %v257_v7, %v254_v6  ;;  %v253_v10 = vld [vmem:[#allocation5 + $0x30] sm:$0xff]  ;;  %v260_v12 = vld [vmem:[#allocation5 + $0x68] sm:$0xff]  ;;  %1719 = vmatprep.subr.bf16.mxu0 %v1718_v4  ;;  %v259_v16 = vld [vmem:[#allocation5 + $0x60] sm:$0xff]  ;;  %s244_s8 = scalar_lea.vmem [#allocation8], %s1488_s13  ;;  %s1523_s28 = sshll.u32 %s2226_s19, 8 }
  0x6e   : > { %1721 = vmatpush1.bf16.msra.mxu0 %v1720_v8  ;;  %v1724_v14 = vpack.c.bf16 %v256_v11, %v253_v10  ;;  %v1726_v15 = vpack.c.bf16 %v263_v13, %v260_v12  ;;  %v262_v17 = vld [vmem:[#allocation5 + $0x78] sm:$0xff]  ;;  %v269_v19 = vld [vmem:[#allocation5 + $0xb0] sm:$0xff]  ;;  %v268_v23 = vld [vmem:[#allocation5 + $0xa8] sm:$0xff]  ;;  %s1387_s30 = sshll.u32 %s244_s8, 4  ;;  %s2531_s29 = scalar_lea.hbm %s2579_s4, %s1523_s28  ;;  %s2526_s30 = int_to_ptr.vmem [resolvable:$true] %s1387_s30 }
  0x6f   : > { %1723 = vmatprep.subr.bf16.mxu0 %v1722_v9  ;;  %v266_v18 = vld [vmem:[#allocation5 + $0x98] sm:$0xff]  ;;  %v1728_v20 = vpack.c.bf16 %v262_v17, %v259_v16  ;;  %v265_v22 = vld [vmem:[#allocation5 + $0x90] sm:$0xff]  ;;  %v272_v24 = vld [vmem:[#allocation5 + $0xc8] sm:$0xff]  ;;  %s1374_s5 = scalar_lea.sflag [#allocation4], %s2383_s10  ;;  %s2094_s12 = scalar_lea.vmem %s2526_s30, 256 }
  0x70   : > { %v1730_v21 = vpack.c.bf16 %v269_v19, %v266_v18  ;;  %v275_v25 = vld [vmem:[#allocation5 + $0xe0] sm:$0xff]  ;;  %v249_v27 = vld [vmem:[#allocation5 + $0x10] sm:$0xff]  ;;  %v252_v28 = vld [vmem:[#allocation5 + $0x28] sm:$0xff]  ;;  %v1732_v29 = vpack.c.bf16 %v268_v23, %v265_v22  ;;  %p2095_p11 = scmp.ne.s32.totalorder %s2526_s30, %s2094_s12  ;;  %p2595_p0 = scmp.ne.s32.totalorder %s2588_s26, 0 }
  0x71   : > { %v2401_v26 = vld [vmem:[%s2389_s25] sm:$0xff]  ;;  %v1750_v31 = vpack.c.bf16 %v252_v28, %v249_v27  ;;  %v258_v33 = vld [vmem:[#allocation5 + $0x58] sm:$0xff]  ;;  %v1734_v34 = vpack.c.bf16 %v275_v25, %v272_v24  ;;  %v264_v38 = vld [vmem:[#allocation5 + $0x88] sm:$0xff]  ;;  %s2177_s19 = smov [#allocation8]  }
  0x72   : > { %1725 = vmatpush1.bf16.msra.mxu0 %v1724_v14  ;;  %1624 = vmatprep.mubr.f32.mxu1 %v2401_v26  ;;  %v271_v30 = vld [vmem:[#allocation5 + $0xc0] sm:$0xff]  ;;  %v274_v35 = vld [vmem:[#allocation5 + $0xd8] sm:$0xff]  ;;  %v261_v37 = vld [vmem:[#allocation5 + $0x70] sm:$0xff]  ;;  %p2096_p1 = pnand %p2095_p11, %p2595_p0  ;;  %s2098_s13 = sshll.u32 %s2177_s19, 4  ;;  %s2099_s13 = int_to_ptr.vmem [resolvable:$false] %s2098_s13 }
  0x73   : > { %1727 = vmatprep.subr.bf16.mxu0 %v1726_v15  ;;  %v255_v32 = vld [vmem:[#allocation5 + $0x40] sm:$0xff]  ;;  %v278_v39 = vld [vmem:[#allocation5 + $0xf8] sm:$0xff]  ;;  %v281_v40 = vld [vmem:[#allocation5 + $0x110] sm:$0xff]  ;;  %1751 = vmatprep.subr.bf16.mxu1 %v1750_v31  ;;  %v1736_v41 = vpack.c.bf16 %v274_v35, %v271_v30  ;;  %v1758_v43 = vpack.c.bf16 %v264_v38, %v261_v37  ;;  %s2100_s24 = scalar_lea.vmem %s2099_s13, 512  ;;  %p2101_p5 = scmp.lt.s32.totalorder %s2526_s30, %s2099_s13 }
  0x74   : > { %v1754_v36 = vpack.c.bf16 %v258_v33, %v255_v32  ;;  %1753 = vmatpush3.bf16.msra.mxu1 %v1750_v31  ;;  %v277_v42 = vld [vmem:[#allocation5 + $0xf0] sm:$0xff]  ;;  %v1738_v44 = vpack.c.bf16 %v281_v40, %v278_v39  ;;  %v280_v45 = vld [vmem:[#allocation5 + $0x108] sm:$0xff]  ;;  %v267_v46 = vld [vmem:[#allocation5 + $0xa0] sm:$0xff]  ;;  %p2097_p3 = pneg %p2096_p1  ;;  %p2102_p9 = scmp.lt.s32.totalorder %s2100_s24, %s2094_s12 }
  0x75   : > { %v270_v47 = vld [vmem:[#allocation5 + $0xb8] sm:$0xff]  ;;  %v284_v48 = vld [vmem:[#allocation5 + $0x128] sm:$0xff]  ;;  %v287_v49 = vld [vmem:[#allocation5 + $0x140] sm:$0xff]  ;;  %v1740_v50 = vpack.c.bf16 %v280_v45, %v277_v42 }
  0x76   : > { %1729 = vmatpush1.bf16.msra.mxu0 %v1728_v20  ;;  %1755 = vmatprep.subr.bf16.mxu1 %v1754_v36  ;;  %v283_v51 = vld [vmem:[#allocation5 + $0x120] sm:$0xff]  ;;  %v1762_v52 = vpack.c.bf16 %v270_v47, %v267_v46  ;;  %v1742_v53 = vpack.c.bf16 %v287_v49, %v284_v48  ;;  %v286_v54 = vld [vmem:[#allocation5 + $0x138] sm:$0xff]  ;;  %v273_v55 = vld [vmem:[#allocation5 + $0xd0] sm:$0xff]  ;;  %p2103_p12 = por %p2102_p9, %p2101_p5 }
  0x77   : > { %1731 = vmatprep.subr.bf16.mxu0 %v1730_v21  ;;  %v276_v56 = vld [vmem:[#allocation5 + $0xe8] sm:$0xff]  ;;  %v290_v57 = vld [vmem:[#allocation5 + $0x158] sm:$0xff]  ;;  %v293_v58 = vld [vmem:[#allocation5 + $0x170] sm:$0xff]  ;;  %v1744_v59 = vpack.c.bf16 %v286_v54, %v283_v51 }
  0x78   : > { %1757 = vmatpush3.bf16.msra.mxu1 %v1754_v36  ;;  %v289_v60 = vld [vmem:[#allocation5 + $0x150] sm:$0xff]  ;;  %v1766_v61 = vpack.c.bf16 %v276_v56, %v273_v55  ;;  %v1746_v62 = vpack.c.bf16 %v293_v58, %v290_v57  ;;  %v292_v63 = vld [vmem:[#allocation5 + $0x168] sm:$0xff]  ;;  %v279_v1 = vld [vmem:[#allocation5 + $0x100] sm:$0xff]  ;;  %p2104_p2 = pnand %p2103_p12, %p2097_p3 }
  0x79   : > { %1759 = vmatprep.subr.bf16.mxu1 %v1758_v43  ;;  %v282_v2 = vld [vmem:[#allocation5 + $0x118] sm:$0xff]  ;;  %v1748_v3 = vpack.c.bf16 %v292_v63, %v289_v60  ;;  %v285_v5 = vld [vmem:[#allocation5 + $0x130] sm:$0xff]  ;;  %v288_v6 = vld [vmem:[#allocation5 + $0x148] sm:$0xff] }
  0x7a   : > { %1733 = vmatpush1.bf16.msra.mxu0 %v1732_v29  ;;  %v1770_v4 = vpack.c.bf16 %v282_v2, %v279_v1  ;;  %v1774_v7 = vpack.c.bf16 %v288_v6, %v285_v5  ;;  %v291_v8 = vld [vmem:[#allocation5 + $0x160] sm:$0xff]  ;;  %v294_v9 = vld [vmem:[#allocation5 + $0x178] sm:$0xff]  ;;  %vm2415_vm1 = vmpackc.low %vm447_vm0, %vm447_vm0 }
  0x7b   : > { %1735 = vmatprep.subr.bf16.mxu0 %v1734_v34  ;;  %v246_v10 = vld [vmem:[%s2389_s25 + $0x8] sm:$0xff]  ;;  %v1778_v11 = vpack.c.bf16 %v294_v9, %v291_v8 }
  0x7c   : > { %1761 = vmatpush3.bf16.msra.mxu1 %v1758_v43 }
  0x7d   : > { %1763 = vmatprep.subr.bf16.mxu1 %v1762_v52 }
  0x7e   : > { %1737 = vmatpush1.bf16.msra.mxu0 %v1736_v41 }
  0x7f   : > { %1739 = vmatprep.subr.bf16.mxu0 %v1738_v44 }
  0x80   : > { %1765 = vmatpush3.bf16.msra.mxu1 %v1762_v52 }
  0x81   : > { %1767 = vmatprep.subr.bf16.mxu1 %v1766_v61 }
  0x82   : > { %1741 = vmatpush1.bf16.msra.mxu0 %v1740_v50 }
  0x83   : > { %1743 = vmatprep.subr.bf16.mxu0 %v1742_v53 }
  0x84   : > { %1769 = vmatpush3.bf16.msra.mxu1 %v1766_v61 }
  0x85   : > { %1771 = vmatprep.subr.bf16.mxu1 %v1770_v4 }
  0x86   : > { %1745 = vmatpush1.bf16.msra.mxu0 %v1744_v59 }
  0x87   : > { %1747 = vmatprep.subr.bf16.mxu0 %v1746_v62 }
  0x88   : > { %1773 = vmatpush3.bf16.msra.mxu1 %v1770_v4 }
  0x89   : > { %1775 = vmatprep.subr.bf16.mxu1 %v1774_v7 }
  0x8a   : > { %1749 = vmatpush1.bf16.msra.mxu0 %v1748_v3 }
  0x8c   : > { %1777 = vmatpush3.bf16.msra.mxu1 %v1774_v7 }
  0x8d   : > { %360 = vmatmul.mubr.f32.vlgmr.msra.gmra.mrb[0].mxu0 %v2401_v26  ;;  %1779 = vmatprep.subr.bf16.mxu1 %v1778_v11 }
  0x8e   : > { %365 = vmatprep.mubr.f32.mxu0 %v2173_v0 }
  0x90   : > { %1781 = vmatpush3.bf16.msra.mxu1 %v1778_v11 }
  0x91   : > { %366 = vmatmul.mubr.f32.gmra.mrb[2].mxu0 %v246_v10 }
  0x93   : > { %1625 = vmatmul.mubr.f32.vlgmr.msra.gmra.mrb[0].mxu1 %v246_v10 }
 0x160   : > { %v2407_v12 = vpop.f32.mrb[0].mxu0 }
 0x161   : > { %v363_v13 = vpop.f32.mrb[1].mxu0  ;;  %1631 = vmatprep.mubr.msk.f32.mxu1 %vm447_vm0, %v2407_v12 }
 0x164   : > { %v2411_v14 = vpop.f32.mrb[2].mxu0 }
 0x165   : > { %v369_v15 = vpop.f32.mrb[3].mxu0 }
 0x166   : > { %v1782_v16 = vpack.c.bf16 %v369_v15, %v363_v13  ;;  %v2419_v17 = vpack.i.bf16 %v369_v15, %v363_v13  ;;  %v1626_v18 = vpop.f32.mrb[0].mxu1 }
 0x167   : > { %v438_v19 = vpop.f32.mrb[1].mxu1 }
 0x168   : > { %1932 = vrot.lane.b32.xlu1 %v2419_v17, %s2174_s21  ;;  %1784 = vmatprep.subr.msk.bf16.mxu1 %vm2415_vm1, %v1782_v16  ;;  %v1788_v20 = vpack.c.bf16 %v1626_v18, %v438_v19  ;;  %v2429_v21 = vpack.i.bf16 %v1626_v18, %v438_v19 }
 0x169   : > { %1787 = vmatpush3.bf16.xpose.msk.msra.mxu1 %vm2415_vm1, %v1782_v16 }
 0x16a   : > { %1789 = vmatprep.subr.bf16.mxu1 %v1788_v20 }
 0x16c   : > { %1937 = vrot.lane.b32.xlu1 %v2419_v17, %s2175_s23 }
 0x170   : > { %641 = vrot.lane.b32.xlu1 %v2411_v14, %s2174_s21  ;;  %1632 = vmatmul.mubr.msk.f32.vlgmr.msra.gmra.mrb[2].mxu1 %vm447_vm0, %v2411_v14 }
 0x171   : > { %1791 = vmatpush3.bf16.msra.mxu1 %v1788_v20 }
 0x174   : > { %841 = vrot.lane.b32.xlu1 %v2407_v12, %s2175_s23 }
 0x178   : > { %843 = vrot.lane.b32.xlu1 %v2411_v14, %s2175_s23 }
 0x17c   : > { %1942 = vrot.lane.b32.xlu1 %v2429_v21, %s2175_s23 }
 0x1da   : > { %v1933_v22 = vpop.permute.xlu1 %1932 }
 0x1db   : > { %v1935_v23 = vunpack.i.h.bf16 %v1933_v22  ;;  %v1934_v24 = vunpack.i.l.bf16 %v1933_v22 }
 0x1dd   : > { %v1792_v25 = vpack.c.bf16 %v1935_v23, %v1934_v24 }
 0x1de   : > { %v1938_v30 = vpop.permute.xlu1 %1937 }
 0x1df   : > { %1794 = vmatprep.subr.msk.bf16.mxu1 %vm2415_vm1, %v1792_v25  ;;  %v1940_v40 = vunpack.i.h.bf16 %v1938_v30  ;;  %v1939_v41 = vunpack.i.l.bf16 %v1938_v30 }
 0x1e1   : > { %v1802_v44 = vpack.c.bf16 %v1940_v40, %v1939_v41 }
 0x1e2   : > { %v642_v35 = vpop.permute.xlu1 %641 }
 0x1e6   : > { %v842_v38 = vpop.permute.xlu1 %841 }
 0x1ea   : > { %v844_v42 = vpop.permute.xlu1 %843 }
 0x1ee   : > { %v1943_v46 = vpop.permute.xlu1 %1942 }
 0x1ef   : > { %v1945_v47 = vunpack.i.h.bf16 %v1943_v46  ;;  %v1944_v48 = vunpack.i.l.bf16 %v1943_v46 }
 0x1f1   : > { %v1808_v49 = vpack.c.bf16 %v1945_v47, %v1944_v48 }
 0x243   : > { %v1633_v26 = vpop.f32.mrb[2].mxu1 }
 0x244   : > { %v526_v27 = vpop.f32.mrb[3].mxu1  ;;  %v539_v29 = vsel %vm535_vm2, %v1633_v26, -inf }
 0x245   : > { %v536_v28 = vsel %vm535_vm2, %v526_v27, -inf }
 0x246   : > { %537 = vmax.xlane.f32.xlu0 %v536_v28 }
 0x24a   : > { %540 = vmax.xlane.f32.xlu0 %v539_v29 }
 0x260   : > { %639 = vrot.lane.b32.xlu0 %v2407_v12, %s2174_s21 }
 0x2d3   : > { %v538_v31 = vpop.xlane.xlu0 %537 }
 0x2d4   : > { %v542_v32 = vsub.f32 %v526_v27, %v538_v31 }
 0x2d6   : > { %v544_v33 = vmul.f32 1.442695, %v542_v32 }
 0x2d7   : > { %v541_v34 = vpop.xlane.xlu0 %540 }
 0x2d8   : > { %1976 = vpow2.f32 %v544_v33  ;;  %v543_v36 = vsub.f32 %v1633_v26, %v541_v34 }
 0x2da   : > { %v546_v37 = vmul.f32 1.442695, %v543_v36 }
 0x2db   : > { %v640_v45 = vpop.permute.xlu0 %639 }
 0x2dc   : > { %1978 = vpow2.f32 %v546_v37 }
 0x2e2   : > { %v2447_v39 = vpop.eup %1976 }
 0x2e3   : > { %1638 = vmatprep.mubr.msk.f32.mxu1 %vm535_vm2, %v2447_v39 }
 0x2e6   : > { %v2451_v43 = vpop.eup %1978 }
 0x2e7   : > { %1639 = vmatmul.mubr.msk.f32.vlgmr.msra.gmra.mrb[4].mxu1 %vm535_vm2, %v2451_v43  ;;  %v551_v48 = vsel %vm535_vm2, %v2451_v43, 0.0  ;;  %v1273_v43 = vld [vmem:[#allocation7] sm:$0xff] }
 0x2e8   : > { %1797 = vmatpush3.bf16.xpose.msk.msra.mxu1 %vm2415_vm1, %v1792_v25  ;;  %1645 = vmatprep.mubr.msk.f32.mxu1 %vm447_vm0, %v640_v45 }
 0x2e9   : > { %1804 = vmatprep.subr.msk.bf16.mxu1 %vm2415_vm1, %v1802_v44 }
 0x2ef   : > { %1646 = vmatmul.mubr.msk.f32.vlgmr.msra.gmra.mrb[6].mxu1 %vm447_vm0, %v642_v35 }
 0x2f0   : > { %1807 = vmatpush3.bf16.xpose.msk.msra.mxu1 %vm2415_vm1, %v1802_v44  ;;  %1659 = vmatprep.mubr.msk.f32.mxu1 %vm447_vm0, %v842_v38 }
 0x2f1   : > { %1809 = vmatprep.subr.bf16.mxu1 %v1808_v49 }
 0x2f7   : > { %1660 = vmatmul.mubr.msk.f32.vlgmr.msra.gmra.mrb[8].mxu1 %vm447_vm0, %v844_v42 }
 0x2f8   : > { %1811 = vmatpush3.bf16.msra.mxu1 %v1808_v49  ;;  %v548_v49 = vsel %vm535_vm2, %v2447_v39, 0.0 }
 0x3ba   : > { %v2465_v50 = vpop.f32.mrb[4].mxu1 }
 0x3bb   : > { %v2467_v51 = vpop.f32.mrb[5].mxu1 }
 0x3c2   : > { %v1647_v52 = vpop.f32.mrb[6].mxu1 }
 0x3c3   : > { %v721_v53 = vpop.f32.mrb[7].mxu1  ;;  %v733_v58 = vsel %vm535_vm2, %v1647_v52, -inf }
 0x3c4   : > { %v730_v59 = vsel %vm535_vm2, %v721_v53, -inf }
 0x3ca   : > { %v1661_v54 = vpop.f32.mrb[8].mxu1 }
 0x3cb   : > { %v923_v55 = vpop.f32.mrb[9].mxu1  ;;  %v935_v56 = vsel %vm535_vm2, %v1661_v54, -inf }
 0x3cc   : > { %936 = vmax.xlane.f32.xlu0 %v935_v56  ;;  %v932_v57 = vsel %vm535_vm2, %v923_v55, -inf }
 0x3cd   : > { %933 = vmax.xlane.f32.xlu1 %v932_v57 }
 0x3de   : > { %1041 = vrot.lane.b32.xlu1 %v2407_v12, %s2176_s7 }
 0x3e2   : > { %1947 = vrot.lane.b32.xlu0 %v2419_v17, %s2176_s7  ;;  %1043 = vrot.lane.b32.xlu1 %v2411_v14, %s2176_s7 }
 0x401   : > { %734 = vmax.xlane.f32.xlu0 %v733_v58 }
 0x406   : > { %731 = vmax.xlane.f32.xlu1 %v730_v59 }
 0x459   : > { %v937_v60 = vpop.xlane.xlu0 %936 }
 0x45a   : > { %v939_v61 = vsub.f32 %v1661_v54, %v937_v60  ;;  %v934_v62 = vpop.xlane.xlu1 %933 }
 0x45b   : > { %v938_v63 = vsub.f32 %v923_v55, %v934_v62  ;;  %v1275_v62 = vld [vmem:[#allocation7 + $0x10] sm:$0xff] }
 0x45c   : > { %v942_v1 = vmul.f32 1.442695, %v939_v61  ;;  %v1274_v61 = vld [vmem:[#allocation7 + $0x8] sm:$0xff] }
 0x45d   : > { %v940_v2 = vmul.f32 1.442695, %v938_v63  ;;  %v1948_v3 = vpop.permute.xlu0 %1947  ;;  %v1822_v39 = vpack.c.bf16 %v1274_v61, %v1273_v43  ;;  %v1276_v63 = vld [vmem:[#allocation7 + $0x18] sm:$0xff] }
 0x45e   : > { %v1950_v4 = vunpack.i.h.bf16 %v1948_v3  ;;  %v1949_v5 = vunpack.i.l.bf16 %v1948_v3  ;;  %v1042_v9 = vpop.permute.xlu1 %1041  ;;  %v1278_v3 = vld [vmem:[#allocation7 + $0x28] sm:$0xff] }
 0x45f   : > { %1980 = vpow2.f32 %v940_v2  ;;  %v1277_v2 = vld [vmem:[#allocation7 + $0x20] sm:$0xff] }
 0x460   : > { %1982 = vpow2.f32 %v942_v1  ;;  %v1812_v6 = vpack.c.bf16 %v1950_v4, %v1949_v5  ;;  %v1826_v1 = vpack.c.bf16 %v1276_v63, %v1275_v62  ;;  %v1830_v4 = vpack.c.bf16 %v1278_v3, %v1277_v2  ;;  %v1279_v5 = vld [vmem:[#allocation7 + $0x30] sm:$0xff] }
 0x462   : > { %1814 = vmatprep.subr.msk.bf16.mxu1 %vm2415_vm1, %v1812_v6  ;;  %v1044_v10 = vpop.permute.xlu1 %1043 }
 0x469   : > { %v1981_v7 = vpop.eup %1980 }
 0x46a   : > { %v1983_v8 = vpop.eup %1982  ;;  %1666 = vmatprep.mubr.msk.f32.mxu1 %vm535_vm2, %v1981_v7  ;;  %v944_v28 = vsel %vm535_vm2, %v1981_v7, 0.0 }
 0x46b   : > { %1667 = vmatmul.mubr.msk.f32.vlgmr.msra.gmra.mrb[10].mxu1 %vm535_vm2, %v1983_v8  ;;  %v947_v27 = vsel %vm535_vm2, %v1983_v8, 0.0  ;;  %v1281_v8 = vld [vmem:[#allocation7 + $0x40] sm:$0xff] }
 0x46c   : > { %1817 = vmatpush3.bf16.xpose.msk.msra.mxu1 %vm2415_vm1, %v1812_v6  ;;  %1673 = vmatprep.mubr.msk.f32.mxu1 %vm447_vm0, %v1042_v9  ;;  %v1280_v6 = vld [vmem:[#allocation7 + $0x38] sm:$0xff]  ;;  %v1282_v9 = vld [vmem:[#allocation7 + $0x48] sm:$0xff] }
 0x46d   : > { %v1834_v7 = vpack.c.bf16 %v1280_v6, %v1279_v5 }
 0x473   : > { %1674 = vmatmul.mubr.msk.f32.vlgmr.msra.gmra.mrb[12].mxu1 %vm447_vm0, %v1044_v10  ;;  %v1838_v10 = vpack.c.bf16 %v1282_v9, %v1281_v8 }
 0x48e   : > { %v735_v20 = vpop.xlane.xlu0 %734 }
 0x48f   : > { %v737_v22 = vsub.f32 %v1647_v52, %v735_v20 }
 0x491   : > { %v740_v23 = vmul.f32 1.442695, %v737_v22 }
 0x493   : > { %v732_v11 = vpop.xlane.xlu1 %731 }
 0x494   : > { %v736_v12 = vsub.f32 %v721_v53, %v732_v11  ;;  %v1283_v11 = vld [vmem:[#allocation7 + $0x50] sm:$0xff] }
 0x496   : > { %v738_v13 = vmul.f32 1.442695, %v736_v12  ;;  %v1284_v12 = vld [vmem:[#allocation7 + $0x58] sm:$0xff] }
 0x498   : > { %1984 = vpow2.f32 %v738_v13  ;;  %v1842_v13 = vpack.c.bf16 %v1284_v12, %v1283_v11 }
 0x499   : > { %1986 = vpow2.f32 %v740_v23 }
 0x4a2   : > { %v1985_v14 = vpop.eup %1984 }
 0x4a3   : > { %1652 = vmatprep.mubr.msk.f32.mxu0 %vm535_vm2, %v1985_v14  ;;  %v1987_v24 = vpop.eup %1986  ;;  %v742_v25 = vsel %vm535_vm2, %v1985_v14, 0.0  ;;  %v1285_v14 = vld [vmem:[#allocation7 + $0x60] sm:$0xff] }
 0x4a4   : > { %v745_v26 = vsel %vm535_vm2, %v1987_v24, 0.0 }
 0x53e   : > { %v2488_v15 = vpop.f32.mrb[10].mxu1 }
 0x53f   : > { %v2490_v16 = vpop.f32.mrb[11].mxu1 }
 0x546   : > { %v1675_v17 = vpop.f32.mrb[12].mxu1 }
 0x547   : > { %v1123_v18 = vpop.f32.mrb[13].mxu1  ;;  %v1135_v0 = vsel %vm535_vm2, %v1675_v17, -inf }
 0x548   : > { %1136 = vmax.xlane.f32.xlu1 %v1135_v0  ;;  %v1132_v19 = vsel %vm535_vm2, %v1123_v18, -inf  ;;  %v1287_v0 = vld [vmem:[#allocation7 + $0x70] sm:$0xff] }
 0x549   : > { %1133 = vmax.xlane.f32.xlu0 %v1132_v19  ;;  %v1288_v19 = vld [vmem:[#allocation7 + $0x78] sm:$0xff] }
 0x54a   : > { %v1850_v20 = vpack.c.bf16 %v1288_v19, %v1287_v0 }
 0x559   : > { %1957 = vrot.lane.b32.xlu1 %v2429_v21, %s2176_s7 }
 0x55f   : > { %1952 = vrot.lane.b32.xlu0 %v2429_v21, %s2174_s21 }
 0x57d   : > { %743 = vadd.xlane.f32.xlu1 %v742_v25 }
 0x57e   : > { %746 = vadd.xlane.f32.xlu0 %v745_v26 }
 0x581   : > { %948 = vadd.xlane.f32.xlu1 %v947_v27 }
 0x582   : > { %945 = vadd.xlane.f32.xlu0 %v944_v28 }
 0x5d5   : > { %v1137_v29 = vpop.xlane.xlu1 %1136 }
 0x5d6   : > { %v1139_v30 = vsub.f32 %v1675_v17, %v1137_v29  ;;  %v1134_v21 = vpop.xlane.xlu0 %1133 }
 0x5d7   : > { %v1138_v31 = vsub.f32 %v1123_v18, %v1134_v21 }
 0x5d8   : > { %v1142_v32 = vmul.f32 1.442695, %v1139_v30 }
 0x5d9   : > { %v1140_v33 = vmul.f32 1.442695, %v1138_v31  ;;  %v1958_v34 = vpop.permute.xlu1 %1957 }
 0x5da   : > { %1988 = vpow2.f32 %v1142_v32  ;;  %v1960_v35 = vunpack.i.h.bf16 %v1958_v34  ;;  %v1953_v36 = vpop.permute.xlu0 %1952  ;;  %v1959_v37 = vunpack.i.l.bf16 %v1958_v34 }
 0x5db   : > { %1990 = vpow2.f32 %v1140_v33  ;;  %v1955_v38 = vunpack.i.h.bf16 %v1953_v36  ;;  %v1954_v40 = vunpack.i.l.bf16 %v1953_v36 }
 0x5dc   : > { %v1818_v42 = vpack.c.bf16 %v1960_v35, %v1959_v37 }
 0x5dd   : > { %v1798_v41 = vpack.c.bf16 %v1955_v38, %v1954_v40 }
 0x5df   : > { %1799 = vmatprep.subr.bf16.mxu0 %v1798_v41 }
 0x5e0   : > { %1801 = vmatpush3.bf16.msra.mxu0 %v1798_v41 }
 0x5e1   : > { %1819 = vmatprep.subr.bf16.mxu0 %v1818_v42 }
 0x5e3   : > { %1653 = vmatmul.mubr.msk.f32.vlgmr.msra.gmra.mrb[4].mxu0 %vm535_vm2, %v1987_v24 }
 0x5e4   : > { %v1989_v44 = vpop.eup %1988  ;;  %1821 = vmatpush3.bf16.msra.mxu0 %v1818_v42 }
 0x5e5   : > { %v1991_v45 = vpop.eup %1990  ;;  %v1147_v46 = vsel %vm535_vm2, %v1989_v44, 0.0  ;;  %1823 = vmatprep.subr.bf16.mxu0 %v1822_v39 }
 0x5e6   : > { %1680 = vmatprep.mubr.msk.f32.mxu0 %vm535_vm2, %v1991_v45  ;;  %1148 = vadd.xlane.f32.xlu1 %v1147_v46  ;;  %v1144_v47 = vsel %vm535_vm2, %v1991_v45, 0.0 }
 0x5e7   : > { %1145 = vadd.xlane.f32.xlu0 %v1144_v47  ;;  %1681 = vmatmul.mubr.msk.f32.vlgmr.msra.gmra.mrb[6].mxu0 %vm535_vm2, %v1989_v44 }
 0x5e8   : > { %1825 = vmatpush3.bf16.msra.mxu0 %v1822_v39 }
 0x5e9   : > { %1827 = vmatprep.subr.bf16.mxu0 %v1826_v1 }
 0x5ea   : > { %552 = vadd.xlane.f32.xlu1 %v551_v48 }
 0x5eb   : > { %549 = vadd.xlane.f32.xlu0 %v548_v49 }
 0x5ec   : > { %1829 = vmatpush3.bf16.msra.mxu0 %v1826_v1 }
 0x5ed   : > { %1831 = vmatprep.subr.bf16.mxu0 %v1830_v4 }
 0x5f0   : > { %1833 = vmatpush3.bf16.msra.mxu0 %v1830_v4 }
 0x5f1   : > { %1835 = vmatprep.subr.bf16.mxu0 %v1834_v7 }
 0x5f4   : > { %1837 = vmatpush3.bf16.msra.mxu0 %v1834_v7 }
 0x5f5   : > { %1839 = vmatprep.subr.bf16.mxu0 %v1838_v10 }
 0x5f8   : > { %1841 = vmatpush3.bf16.msra.mxu0 %v1838_v10 }
 0x5f9   : > { %1843 = vmatprep.subr.bf16.mxu0 %v1842_v13 }
 0x5fc   : > { %1845 = vmatpush3.bf16.msra.mxu0 %v1842_v13 }
 0x60a   : > { %v744_v52 = vpop.xlane.xlu1 %743 }
 0x60b   : > { %v747_v53 = vpop.xlane.xlu0 %746 }
 0x60e   : > { %v949_v54 = vpop.xlane.xlu1 %948 }
 0x60f   : > { %1992 = vrcp.f32 %v949_v54  ;;  %v946_v55 = vpop.xlane.xlu0 %945 }
 0x610   : > { %1994 = vrcp.f32 %v946_v55 }
 0x611   : > { %1996 = vrcp.f32 %v747_v53 }
 0x612   : > { %1998 = vrcp.f32 %v744_v52 }
 0x619   : > { %v1993_v56 = vpop.eup %1992 }
 0x61a   : > { %v1995_v57 = vpop.eup %1994  ;;  %v1040_v58 = vmul.f32 %v1993_v56, %v2488_v15  ;;  %v1286_v15 = vld [vmem:[#allocation7 + $0x68] sm:$0xff] }
 0x61b   : > { %v1039_v59 = vmul.f32 %v1995_v57, %v2490_v16  ;;  %v1846_v17 = vpack.c.bf16 %v1286_v15, %v1285_v14  ;;  %v1997_v22 = vpop.eup %1996 }
 0x61c   : > { %v1999_v24 = vpop.eup %1998 }
 0x61d   : > { %v1966_v60 = vpack.i.bf16 %v1040_v58, %v1039_v59  ;;  %1847 = vmatprep.subr.bf16.mxu0 %v1846_v17 }
 0x61e   : > { %1849 = vmatpush3.bf16.msra.mxu0 %v1846_v17 }
 0x61f   : > { %1967 = vrot.lane.b32.xlu1 %v1966_v60, %s2175_s23  ;;  %1851 = vmatprep.subr.bf16.mxu0 %v1850_v20 }
 0x622   : > { %1853 = vmatpush3.bf16.msra.mxu0 %v1850_v20 }
 0x673   : > { %v1149_v16 = vpop.xlane.xlu1 %1148 }
 0x674   : > { %v1146_v18 = vpop.xlane.xlu0 %1145  ;;  %2000 = vrcp.f32 %v1149_v16 }
 0x675   : > { %2002 = vrcp.f32 %v1146_v18 }
 0x677   : > { %v553_v35 = vpop.xlane.xlu1 %552 }
 0x678   : > { %v550_v36 = vpop.xlane.xlu0 %549  ;;  %2004 = vrcp.f32 %v553_v35 }
 0x679   : > { %2006 = vrcp.f32 %v550_v36 }
 0x67e   : > { %v2001_v28 = vpop.eup %2000 }
 0x67f   : > { %v2003_v21 = vpop.eup %2002 }
 0x682   : > { %v2005_v37 = vpop.eup %2004 }
 0x683   : > { %v2007_v38 = vpop.eup %2006  ;;  %v638_v46 = vmul.f32 %v2005_v37, %v2465_v50  ;;  %v1516_v50 = vld [vmem:[%s2578_s3] ss:$0 sm:$0xff] }
 0x684   : > { %v637_v42 = vmul.f32 %v2007_v38, %v2467_v51 }
 0x691   : > { %v1968_v40 = vpop.permute.xlu1 %1967 }
 0x692   : > { %v1970_v49 = vunpack.i.h.bf16 %v1968_v40  ;;  %v1969_v52 = vunpack.i.l.bf16 %v1968_v40 }
 0x6b6   : > { %v1654_v23 = vpop.f32.mrb[4].mxu0 }
 0x6b7   : > { %v840_v25 = vmul.f32 %v1997_v22, %v1654_v23  ;;  %v828_v26 = vpop.f32.mrb[5].mxu0 }
 0x6b8   : > { %v839_v27 = vmul.f32 %v1999_v24, %v828_v26 }
 0x6ba   : > { %v1961_v29 = vpack.i.bf16 %v840_v25, %v839_v27  ;;  %v1682_v30 = vpop.f32.mrb[6].mxu0 }
 0x6bb   : > { %v1240_v31 = vmul.f32 %v2001_v28, %v1682_v30  ;;  %v1228_v32 = vpop.f32.mrb[7].mxu0 }
 0x6bc   : > { %v1239_v33 = vmul.f32 %v2003_v21, %v1228_v32  ;;  %1962 = vrot.lane.b32.xlu0 %v1961_v29, %s2176_s7 }
 0x6be   : > { %v1971_v34 = vpack.i.bf16 %v1240_v31, %v1239_v33 }
 0x6c0   : > { %1972 = vrot.lane.b32.xlu1 %v1971_v34, %s2174_s21 }
 0x72e   : > { %v1963_v41 = vpop.permute.xlu0 %1962 }
 0x72f   : > { %v1965_v44 = vunpack.i.h.bf16 %v1963_v41  ;;  %v1964_v45 = vunpack.i.l.bf16 %v1963_v41 }
 0x731   : > { %v1265_v47 = vsel %vm447_vm0, %v637_v42, %v1964_v45  ;;  %v1266_v48 = vsel %vm447_vm0, %v638_v46, %v1965_v44 }
 0x732   : > { %v1973_v53 = vpop.permute.xlu1 %1972  ;;  %v1268_v56 = vsel %vm1267_vm3, %v1265_v47, %v1969_v52  ;;  %v1269_v57 = vsel %vm1267_vm3, %v1266_v48, %v1970_v49 }
 0x733   : > { %v1975_v54 = vunpack.i.h.bf16 %v1973_v53  ;;  %v1974_v55 = vunpack.i.l.bf16 %v1973_v53 }
 0x735   : > { %v1271_v51 = vsel %vm1270_vm4, %v1268_v56, %v1974_v55  ;;  %v1272_v58 = vsel %vm1270_vm4, %v1269_v57, %v1975_v54 }
 0x736   : > { %1715 = vmatprep.mubr.f32.mxu0 %v1271_v51 }
 0x737   : > { %1716 = vmatmul.mubr.f32.vlgmr.msra.gmra.mrb[8].mxu0 %v1272_v58 }
 0x80a   : > { %v1717_v59 = vpop.f32.mrb[8].mxu0 }
 0x80b   : > { %v1368_v60 = vadd.f32 %v1717_v59, %v1516_v50  ;;  %v1362_v43 = vpop.f32.mrb[9].mxu0 }
 0x80c   : > { %v1363_v61 = vadd.f32 %v1516_v50, %v1362_v43 }
 0x80d   : > { %1372 = vst [vmem:[%s244_s8 + $0x8] sm:$0xff] %v1368_v60 }
 0x80e   : > { %1371 = vst [vmem:[%s244_s8] sm:$0xff] %v1363_v61 }
 0x80f   : > { %2107 = shalt.err (!%p2104_p2)
}
 0x810   : > { %s2108_s25 = scalar_lea.hbm %s2531_s29, 256  ;;  %s2112_s7 = scalar_lea.hbm %s2579_s4, 512 }
 0x811   : > { %p2109_p13 = scmp.ne.s32.totalorder %s2531_s29, %s2108_s25  ;;  %p2113_p4 = scmp.lt.u32.totalorder %s2531_s29, %s2579_s4 }
 0x812   : > { %p2114_p7 = scmp.lt.u32.totalorder %s2112_s7, %s2108_s25  ;;  %p2116_p11 = scmp.lt.u32.totalorder %s2108_s25, %s2531_s29 }
 0x813   : > { %p2110_p6 = pnand %p2109_p13, %p2595_p0 }
 0x814   : > { %p2115_p8 = por %p2114_p7, %p2113_p4 }
 0x815   : > { %p2111_p10 = pneg %p2110_p6 }
 0x816   : > { %p2117_p1 = por %p2116_p11, %p2115_p8 }
 0x818   : > { %p2118_p3 = pnand %p2117_p1, %p2111_p10 }
 0x81a   : > { %2121 = shalt.err (!%p2118_p3)
}
 0x81b   : > { %s2178_s9 = smov 128   ;;  %s2179_s28 = smov 8  }
 0x81c   : > { %1864 = dma.vmem_to_hbm [thread:$0]  (%p2595_p0), %s2526_s30, 256, %s2531_s29, %s1374_s5, %s2178_s9, %s2178_s9, %s2179_s28  }
 0x81d PF: > { %s1402_s27 = sand.u32 1, %s2152_s15   ;;  %p2596_p5 = scmp.ne.s32.totalorder %s2584_s22, 0 }
 0x81e   : > { %p2597_p9 = scmp.ge.s32.totalorder %s2164_s18, 2  ;;  %s1403_s20 = scalar_lea.sflag [#allocation4], %s1402_s27 }
 0x820   : > { %p1878_p12 = pnand %p2597_p9, %p2596_p5 }
 0x822   : > { %2147 = dma.done.wait (!%p1878_p12), %s1403_s20, 256  }
 0x823   : > { %2149 = vsyncadd (!%p1878_p12), %s1403_s20, 4294967040  ;;  %p18_p2 = scmp.ge.s32.totalorder %s2318_s11, 4   ;;  %s2598_s15 = smov %s2156_s16 }
 0x824   : > { %s2599_s16 = smov %s2160_s17  ;;  %s2600_s17 = smov %s2327_s14 }
 0x825   : > { %s2601_s18 = smov %s2318_s11  ;;  %20 = sbr.rel (!%p18_p2) target bundleno = 6 (0x6), region = 89 }
 0x82c   :  { %1408 = vsyncpa [#allocation3], 1 }
 0x82d   :  { %1410 = vsyncpa [#allocation3 + $0x1], 1 }
 0x82e   :  { %1411 = vsyncpa [#allocation6], 1 }
 0x82f   :  { %1412 = vsyncpa [#allocation4], 1 }
 0x830   :  { %1414 = vsyncpa [#allocation4 + $0x1], 1 }

// kernel: tpu_custom_call.1
= control target key start
LH: loop header
LB: loop body
LE: loop exit
PB: predicated region body
PF: predicated region fallthrough
CT: control target
= control target key end

     0   :  { %9 = vsyncpa [#allocation3], 0  ;;  %s2575_s0 = inlined_call_operand.hbm [shape: f32[2,16,128], index: 0, kind: input, shape index: {}]   ;;  %s2576_s1 = inlined_call_operand.hbm [shape: f32[128,384], index: 1, kind: input, shape index: {}]   ;;  %s2577_s2 = inlined_call_operand.hbm [shape: f32[128,128], index: 2, kind: input, shape index: {}]   ;;  %s2578_s3 = inlined_call_operand.vmem [shape: f32[1,128], index: 3, kind: input, shape index: {}]   ;;  %s2579_s4 = inlined_call_operand.hbm [shape: f32[2,16,128], index: 4, kind: output, shape index: {}]  }
   0x1   :  { %11 = vsyncpa [#allocation3 + $0x1], 0 }
   0x2   :  { %12 = vsyncpa [#allocation6], 0 }
   0x3   :  { %13 = vsyncpa [#allocation4], 0 }
   0x4   :  { %15 = vsyncpa [#allocation4 + $0x1], 0  ;;  %s2205_s15 = smov 0   ;;  %s2207_s16 = smov 0  }
   0x5   :  { %s2209_s17 = smov 0   ;;  %s2211_s18 = smov 0  }
   0x6 LB: > { %s2226_s19 = sadd.s32 4294967295, %s2164_s18   ;;  %s1479_s20 = sadd.s32 4294967294, %s2164_s18   ;;  %s2164_s18 = sphi %s2211_s18, %s2601_s18   ;;  %s2160_s17 = sphi %s2209_s17, %s2600_s17   ;;  %s2156_s16 = sphi %s2207_s16, %s2599_s16   ;;  %s2152_s15 = sphi %s2205_s15, %s2598_s15  }
   0x7   : > { %p41_p0 = scmp.ne.s32.totalorder %s2156_s16, %s2152_s15  ;;  %p2580_p1 = scmp.eq.s32.totalorder %s2226_s19, 0 }
   0x8   : > { %p134_p3 = scmp.eq.s32.totalorder %s1479_s20, 1  ;;  %p1480_p5 = scmp.ge.s32.totalorder %s2164_s18, 1 }
   0x9   : > { %p2235_p4 = por %p2580_p1, %p41_p0  ;;  %p141_p7 = scmp.lt.s32.totalorder %s2164_s18, 3 }
   0xa   : > { %p2240_p6 = por %p134_p3, %p41_p0  ;;  %s2166_s24 = smov [#allocation5]  }
   0xb   : > { %s2583_s21 = scalar_select %p2235_p4, 1, 0 }
   0xc   : > { %s2584_s22 = scalar_select %p2240_p6, 1, 0 }
   0xd   : > { %p2245_p8 = pnand %p1480_p5, %p141_p7  ;;  %s153_s25 = sshll.u32 %s2166_s24, 4  ;;  %s2249_s25 = int_to_ptr.vmem [resolvable:$true] %s153_s25 }
   0xe   : > { %s2167_s27 = smov [#allocation7]   ;;  %s2008_s5 = scalar_lea.hbm %s2576_s1, 6144 }
   0xf   : > { %p1866_p9 = pneg %p2245_p8  ;;  %s166_s28 = sshll.u32 %s2167_s27, 4  ;;  %s2260_s28 = int_to_ptr.vmem [resolvable:$true] %s166_s28 }
  0x10   : > { %p2009_p12 = scmp.ne.s32.totalorder %s2576_s1, %s2008_s5  ;;  %p2015_p5 = scmp.lt.u32.totalorder %s2008_s5, %s2576_s1 }
  0x11   : > { %p2256_p11 = pnand %p1866_p9, %p2580_p1 }
  0x13   : > { %p2010_p13 = pneg %p2256_p11 }
  0x15   : > { %p2011_p0 = pnand %p2010_p13, %p2009_p12 }
  0x17   : > { %p2012_p3 = pneg %p2011_p0 }
  0x19   : > { %p2017_p7 = pnand %p2015_p5, %p2012_p3 }
  0x1b   : > { %2020 = shalt.err (!%p2017_p7)
}
  0x1c   : > { %s2021_s10 = scalar_lea.vmem %s2249_s25, 6144  ;;  %p2029_p2 = scmp.lt.s32.totalorder %s2249_s25, %s2249_s25 }
  0x1d   : > { %p2022_p9 = scmp.ne.s32.totalorder %s2249_s25, %s2021_s10  ;;  %p2030_p12 = scmp.lt.s32.totalorder %s2021_s10, %s2021_s10 }
  0x1f   : > { %p2024_p10 = pnand %p2022_p9, %p2010_p13  ;;  %p2031_p0 = por %p2030_p12, %p2029_p2 }
  0x21   : > { %p2025_p1 = pneg %p2024_p10 }
  0x23   : > { %p2032_p6 = pnand %p2031_p0, %p2025_p1 }
  0x25   : > { %2035 = shalt.err (!%p2032_p6)
}
  0x26   : > { %s2168_s11 = smov 384   ;;  %s2169_s12 = smov 24  }
  0x27   : > { %1869 = dma.hbm_to_vmem [thread:$0]  (!%p2256_p11), %s2576_s1, 6144, %s2249_s25, [#allocation6], %s2168_s11, %s2168_s11, %s2169_s12  }
  0x28   : > { %s2036_s27 = scalar_lea.hbm %s2577_s2, 2048 }
  0x29   : > { %p2037_p2 = scmp.ne.s32.totalorder %s2577_s2, %s2036_s27  ;;  %p2043_p10 = scmp.lt.u32.totalorder %s2036_s27, %s2577_s2 }
  0x2b   : > { %p2039_p1 = pnand %p2037_p2, %p2010_p13 }
  0x2d   : > { %p2040_p6 = pneg %p2039_p1 }
  0x2f   : > { %p2045_p3 = pnand %p2043_p10, %p2040_p6 }
  0x31   : > { %2048 = shalt.err (!%p2045_p3)
}
  0x32   : > { %s2049_s25 = scalar_lea.vmem %s2260_s28, 2048  ;;  %p2057_p12 = scmp.lt.s32.totalorder %s2260_s28, %s2260_s28 }
  0x33   : > { %p2050_p5 = scmp.ne.s32.totalorder %s2260_s28, %s2049_s25  ;;  %p2058_p0 = scmp.lt.s32.totalorder %s2049_s25, %s2049_s25 }
  0x35   : > { %p2052_p7 = pnand %p2050_p5, %p2010_p13  ;;  %p2059_p2 = por %p2058_p0, %p2057_p12 }
  0x37   : > { %p2053_p9 = pneg %p2052_p7 }
  0x39   : > { %p2060_p1 = pnand %p2059_p2, %p2053_p9 }
  0x3b   : > { %2063 = shalt.err (!%p2060_p1)
}
  0x3c   : > { %s2170_s7 = smov 128   ;;  %s2171_s8 = smov 8  }
  0x3d   : > { %1872 = dma.hbm_to_vmem [thread:$0]  (!%p2256_p11), %s2577_s2, 2048, %s2260_s28, [#allocation6], %s2170_s7, %s2170_s7, %s2171_s8  }
  0x3e   : > { %s2318_s11 = sadd.s32 1, %s2164_s18   ;;  %s28_s13 = sadd.s32 1, %s2160_s17 }
  0x3f   : > { %s25_s12 = ssub.s32 %s2164_s18, %s2318_s11  ;;  %p35_p6 = scmp.ne.s32.totalorder %s2160_s17, %s2156_s16 }
  0x40   : > { %p26_p13 = scmp.eq.s32.totalorder %s25_s12, 0  ;;  %p36_p10 = scmp.eq.s32.totalorder %s2164_s18, 0 }
  0x41   : > { %p2587_p5 = scmp.eq.s32.totalorder %s2226_s19, 1  ;;  %p1883_p9 = scmp.lt.s32.totalorder %s2164_s18, 2 }
  0x42   : > { %s2327_s14 = scalar_select %p26_p13, %s2160_s17, %s28_s13  }
  0x43   : > { %p37_p3 = por %p36_p10, %p35_p6  ;;  %p2331_p7 = por %p2587_p5, %p35_p6 }
  0x44   : > { %s183_s20 = sand.u32 1, %s2160_s17   ;;  %s1522_s28 = sshll.u32 %s2164_s18, 8 }
  0x45   : > { %s2588_s26 = scalar_select %p2331_p7, 1, 0 }
  0x46   : > { %s1484_s24 = sshll.u32 %s183_s20, 4  ;;  %s2341_s30 = scalar_lea.hbm %s2575_s0, %s1522_s28 }
  0x47   : > { %s187_s5 = scalar_lea.vmem [#allocation2], %s1484_s24  ;;  %p2345_p11 = pnand %p1883_p9, %p37_p3 }
  0x48   : > { %s194_s6 = sshll.u32 %s187_s5, 4  ;;  %s2349_s9 = scalar_lea.sflag [#allocation3], %s183_s20  ;;  %s2343_s6 = int_to_ptr.vmem [resolvable:$true] %s194_s6 }
  0x49   : > { %s2064_s10 = scalar_lea.hbm %s2341_s30, 256  ;;  %p2066_p0 = pneg %p2345_p11 }
  0x4a   : > { %p2065_p12 = scmp.ne.s32.totalorder %s2341_s30, %s2064_s10  ;;  %s2069_s24 = scalar_lea.hbm %s2575_s0, 512 }
  0x4b   : > { %p2070_p13 = scmp.lt.u32.totalorder %s2341_s30, %s2575_s0  ;;  %p2071_p6 = scmp.lt.u32.totalorder %s2069_s24, %s2064_s10 }
  0x4c   : > { %p2067_p2 = pnand %p2066_p0, %p2065_p12  ;;  %p2073_p3 = scmp.lt.u32.totalorder %s2064_s10, %s2341_s30 }
  0x4d   : > { %p2072_p10 = por %p2071_p6, %p2070_p13 }
  0x4e   : > { %p2068_p1 = pneg %p2067_p2 }
  0x4f   : > { %p2074_p5 = por %p2073_p3, %p2072_p10 }
  0x51   : > { %p2075_p9 = pnand %p2074_p5, %p2068_p1 }
  0x53   : > { %2078 = shalt.err (!%p2075_p9)
}
  0x54   : > { %s2079_s20 = scalar_lea.vmem %s2343_s6, 256  ;;  %s2172_s29 = smov [#allocation2]  }
  0x55   : > { %p2080_p12 = scmp.ne.s32.totalorder %s2343_s6, %s2079_s20  ;;  %s2084_s5 = sshll.u32 %s2172_s29, 4  ;;  %s2085_s5 = int_to_ptr.vmem [resolvable:$false] %s2084_s5 }
  0x56   : > { %s2086_s12 = scalar_lea.vmem %s2085_s5, 512  ;;  %p2087_p4 = scmp.lt.s32.totalorder %s2343_s6, %s2085_s5 }
  0x57   : > { %p2082_p2 = pnand %p2080_p12, %p2066_p0  ;;  %p2088_p13 = scmp.lt.s32.totalorder %s2086_s12, %s2079_s20 }
  0x59   : > { %p2083_p7 = pneg %p2082_p2  ;;  %p2089_p6 = por %p2088_p13, %p2087_p4 }
  0x5b   : > { %p2090_p10 = pnand %p2089_p6, %p2083_p7 }
  0x5d   : > { %2093 = shalt.err (!%p2090_p10)
}
  0x5e   : > { %1876 = dma.hbm_to_vmem [thread:$0]  (!%p2345_p11), %s2341_s30, 256, %s2343_s6, %s2349_s9, %s2170_s7, %s2170_s7, %s2171_s8  }
  0x5f   : > { %206 = sbr.rel (%p2245_p8) target bundleno = 2077 (0x81d), region = 36  ;;  %s2383_s10 = sand.u32 (!%p2245_p8), 1, %s2156_s16  }
  0x60   : > { %s1488_s13 = sshll.u32 (!%p2245_p8), %s2383_s10, 4  ;;  %s209_s24 = scalar_lea.sflag (!%p2245_p8), [#allocation3], %s2383_s10 }
  0x61   : > { %s2389_s25 = scalar_lea.vmem (!%p2245_p8), [#allocation2], %s1488_s13  ;;  %p2590_p4 = scmp.ne.s32.totalorder (!%p2245_p8), %s2583_s21, 0 }
  0x66   : > { %2139 = dma.done.wait (%p2590_p4), %s209_s24, 256  }
  0x67   : > { %2141 = vsyncadd (%p2590_p4), %s209_s24, 4294967040  ;;  %p2591_p7 = scmp.eq.s32.totalorder %s2226_s19, 0 }
  0x69   : > { %2143 = dma.done.wait (%p2591_p7), [#allocation6], 8192   ;;  %p2592_p8 = pmov %p2591_p7 }
  0x6a   : > { %v2173_v0 = vmov 0.0   ;;  %v248_v1 = vld [vmem:[#allocation5 + $0x8] sm:$0xff]  ;;  %v251_v2 = vld [vmem:[#allocation5 + $0x20] sm:$0xff]  ;;  %v250_v5 = vld [vmem:[#allocation5 + $0x18] sm:$0xff]  ;;  %vm447_vm0 = vcmask 261120   ;;  %s2174_s21 = smov 96  }
  0x6b   : > { %2145 = vsyncadd (%p2592_p8), [#allocation6], 4294959104  ;;  %359 = vmatprep.mubr.f32.mxu0 %v2173_v0  ;;  %v247_v3 = vld [vmem:[#allocation5] sm:$0xff]  ;;  %v1718_v4 = vpack.c.bf16 %v251_v2, %v248_v1  ;;  %v254_v6 = vld [vmem:[#allocation5 + $0x38] sm:$0xff]  ;;  %s2175_s23 = smov 64   ;;  %vm535_vm2 = vcmask 130048  }
  0x6c   : > { %v257_v7 = vld [vmem:[#allocation5 + $0x50] sm:$0xff]  ;;  %v1720_v8 = vpack.c.bf16 %v250_v5, %v247_v3  ;;  %v256_v11 = vld [vmem:[#allocation5 + $0x48] sm:$0xff]  ;;  %v263_v13 = vld [vmem:[#allocation5 + $0x80] sm:$0xff]  ;;  %s2176_s7 = smov 32   ;;  %vm1267_vm3 = vcmask 523264   ;;  %vm1270_vm4 = vcmask 785408  }
  0x6d   : > { %v1722_v9 = vpack.c.bf16 %v257_v7, %v254_v6  ;;  %v253_v10 = vld [vmem:[#allocation5 + $0x30] sm:$0xff]  ;;  %v260_v12 = vld [vmem:[#allocation5 + $0x68] sm:$0xff]  ;;  %1719 = vmatprep.subr.bf16.mxu0 %v1718_v4  ;;  %v259_v16 = vld [vmem:[#allocation5 + $0x60] sm:$0xff]  ;;  %s244_s8 = scalar_lea.vmem [#allocation8], %s1488_s13  ;;  %s1523_s28 = sshll.u32 %s2226_s19, 8 }
  0x6e   : > { %1721 = vmatpush1.bf16.msra.mxu0 %v1720_v8  ;;  %v1724_v14 = vpack.c.bf16 %v256_v11, %v253_v10  ;;  %v1726_v15 = vpack.c.bf16 %v263_v13, %v260_v12  ;;  %v262_v17 = vld [vmem:[#allocation5 + $0x78] sm:$0xff]  ;;  %v269_v19 = vld [vmem:[#allocation5 + $0xb0] sm:$0xff]  ;;  %v268_v23 = vld [vmem:[#allocation5 + $0xa8] sm:$0xff]  ;;  %s1387_s30 = sshll.u32 %s244_s8, 4  ;;  %s2531_s29 = scalar_lea.hbm %s2579_s4, %s1523_s28  ;;  %s2526_s30 = int_to_ptr.vmem [resolvable:$true] %s1387_s30 }
  0x6f   : > { %1723 = vmatprep.subr.bf16.mxu0 %v1722_v9  ;;  %v266_v18 = vld [vmem:[#allocation5 + $0x98] sm:$0xff]  ;;  %v1728_v20 = vpack.c.bf16 %v262_v17, %v259_v16  ;;  %v265_v22 = vld [vmem:[#allocation5 + $0x90] sm:$0xff]  ;;  %v272_v24 = vld [vmem:[#allocation5 + $0xc8] sm:$0xff]  ;;  %s1374_s5 = scalar_lea.sflag [#allocation4], %s2383_s10  ;;  %s2094_s12 = scalar_lea.vmem %s2526_s30, 256 }
  0x70   : > { %v1730_v21 = vpack.c.bf16 %v269_v19, %v266_v18  ;;  %v275_v25 = vld [vmem:[#allocation5 + $0xe0] sm:$0xff]  ;;  %v249_v27 = vld [vmem:[#allocation5 + $0x10] sm:$0xff]  ;;  %v252_v28 = vld [vmem:[#allocation5 + $0x28] sm:$0xff]  ;;  %v1732_v29 = vpack.c.bf16 %v268_v23, %v265_v22  ;;  %p2095_p11 = scmp.ne.s32.totalorder %s2526_s30, %s2094_s12  ;;  %p2595_p0 = scmp.ne.s32.totalorder %s2588_s26, 0 }
  0x71   : > { %v2401_v26 = vld [vmem:[%s2389_s25] sm:$0xff]  ;;  %v1750_v31 = vpack.c.bf16 %v252_v28, %v249_v27  ;;  %v258_v33 = vld [vmem:[#allocation5 + $0x58] sm:$0xff]  ;;  %v1734_v34 = vpack.c.bf16 %v275_v25, %v272_v24  ;;  %v264_v38 = vld [vmem:[#allocation5 + $0x88] sm:$0xff]  ;;  %s2177_s19 = smov [#allocation8]  }
  0x72   : > { %1725 = vmatpush1.bf16.msra.mxu0 %v1724_v14  ;;  %1624 = vmatprep.mubr.f32.mxu1 %v2401_v26  ;;  %v271_v30 = vld [vmem:[#allocation5 + $0xc0] sm:$0xff]  ;;  %v274_v35 = vld [vmem:[#allocation5 + $0xd8] sm:$0xff]  ;;  %v261_v37 = vld [vmem:[#allocation5 + $0x70] sm:$0xff]  ;;  %p2096_p1 = pnand %p2095_p11, %p2595_p0  ;;  %s2098_s13 = sshll.u32 %s2177_s19, 4  ;;  %s2099_s13 = int_to_ptr.vmem [resolvable:$false] %s2098_s13 }
  0x73   : > { %1727 = vmatprep.subr.bf16.mxu0 %v1726_v15  ;;  %v255_v32 = vld [vmem:[#allocation5 + $0x40] sm:$0xff]  ;;  %v278_v39 = vld [vmem:[#allocation5 + $0xf8] sm:$0xff]  ;;  %v281_v40 = vld [vmem:[#allocation5 + $0x110] sm:$0xff]  ;;  %1751 = vmatprep.subr.bf16.mxu1 %v1750_v31  ;;  %v1736_v41 = vpack.c.bf16 %v274_v35, %v271_v30  ;;  %v1758_v43 = vpack.c.bf16 %v264_v38, %v261_v37  ;;  %s2100_s24 = scalar_lea.vmem %s2099_s13, 512  ;;  %p2101_p5 = scmp.lt.s32.totalorder %s2526_s30, %s2099_s13 }
  0x74   : > { %v1754_v36 = vpack.c.bf16 %v258_v33, %v255_v32  ;;  %1753 = vmatpush3.bf16.msra.mxu1 %v1750_v31  ;;  %v277_v42 = vld [vmem:[#allocation5 + $0xf0] sm:$0xff]  ;;  %v1738_v44 = vpack.c.bf16 %v281_v40, %v278_v39  ;;  %v280_v45 = vld [vmem:[#allocation5 + $0x108] sm:$0xff]  ;;  %v267_v46 = vld [vmem:[#allocation5 + $0xa0] sm:$0xff]  ;;  %p2097_p3 = pneg %p2096_p1  ;;  %p2102_p9 = scmp.lt.s32.totalorder %s2100_s24, %s2094_s12 }
  0x75   : > { %v270_v47 = vld [vmem:[#allocation5 + $0xb8] sm:$0xff]  ;;  %v284_v48 = vld [vmem:[#allocation5 + $0x128] sm:$0xff]  ;;  %v287_v49 = vld [vmem:[#allocation5 + $0x140] sm:$0xff]  ;;  %v1740_v50 = vpack.c.bf16 %v280_v45, %v277_v42 }
  0x76   : > { %1729 = vmatpush1.bf16.msra.mxu0 %v1728_v20  ;;  %1755 = vmatprep.subr.bf16.mxu1 %v1754_v36  ;;  %v283_v51 = vld [vmem:[#allocation5 + $0x120] sm:$0xff]  ;;  %v1762_v52 = vpack.c.bf16 %v270_v47, %v267_v46  ;;  %v1742_v53 = vpack.c.bf16 %v287_v49, %v284_v48  ;;  %v286_v54 = vld [vmem:[#allocation5 + $0x138] sm:$0xff]  ;;  %v273_v55 = vld [vmem:[#allocation5 + $0xd0] sm:$0xff]  ;;  %p2103_p12 = por %p2102_p9, %p2101_p5 }
  0x77   : > { %1731 = vmatprep.subr.bf16.mxu0 %v1730_v21  ;;  %v276_v56 = vld [vmem:[#allocation5 + $0xe8] sm:$0xff]  ;;  %v290_v57 = vld [vmem:[#allocation5 + $0x158] sm:$0xff]  ;;  %v293_v58 = vld [vmem:[#allocation5 + $0x170] sm:$0xff]  ;;  %v1744_v59 = vpack.c.bf16 %v286_v54, %v283_v51 }
  0x78   : > { %1757 = vmatpush3.bf16.msra.mxu1 %v1754_v36  ;;  %v289_v60 = vld [vmem:[#allocation5 + $0x150] sm:$0xff]  ;;  %v1766_v61 = vpack.c.bf16 %v276_v56, %v273_v55  ;;  %v1746_v62 = vpack.c.bf16 %v293_v58, %v290_v57  ;;  %v292_v63 = vld [vmem:[#allocation5 + $0x168] sm:$0xff]  ;;  %v279_v1 = vld [vmem:[#allocation5 + $0x100] sm:$0xff]  ;;  %p2104_p2 = pnand %p2103_p12, %p2097_p3 }
  0x79   : > { %1759 = vmatprep.subr.bf16.mxu1 %v1758_v43  ;;  %v282_v2 = vld [vmem:[#allocation5 + $0x118] sm:$0xff]  ;;  %v1748_v3 = vpack.c.bf16 %v292_v63, %v289_v60  ;;  %v285_v5 = vld [vmem:[#allocation5 + $0x130] sm:$0xff]  ;;  %v288_v6 = vld [vmem:[#allocation5 + $0x148] sm:$0xff] }
  0x7a   : > { %1733 = vmatpush1.bf16.msra.mxu0 %v1732_v29  ;;  %v1770_v4 = vpack.c.bf16 %v282_v2, %v279_v1  ;;  %v1774_v7 = vpack.c.bf16 %v288_v6, %v285_v5  ;;  %v291_v8 = vld [vmem:[#allocation5 + $0x160] sm:$0xff]  ;;  %v294_v9 = vld [vmem:[#allocation5 + $0x178] sm:$0xff]  ;;  %vm2415_vm1 = vmpackc.low %vm447_vm0, %vm447_vm0 }
  0x7b   : > { %1735 = vmatprep.subr.bf16.mxu0 %v1734_v34  ;;  %v246_v10 = vld [vmem:[%s2389_s25 + $0x8] sm:$0xff]  ;;  %v1778_v11 = vpack.c.bf16 %v294_v9, %v291_v8 }
  0x7c   : > { %1761 = vmatpush3.bf16.msra.mxu1 %v1758_v43 }
  0x7d   : > { %1763 = vmatprep.subr.bf16.mxu1 %v1762_v52 }
  0x7e   : > { %1737 = vmatpush1.bf16.msra.mxu0 %v1736_v41 }
  0x7f   : > { %1739 = vmatprep.subr.bf16.mxu0 %v1738_v44 }
  0x80   : > { %1765 = vmatpush3.bf16.msra.mxu1 %v1762_v52 }
  0x81   : > { %1767 = vmatprep.subr.bf16.mxu1 %v1766_v61 }
  0x82   : > { %1741 = vmatpush1.bf16.msra.mxu0 %v1740_v50 }
  0x83   : > { %1743 = vmatprep.subr.bf16.mxu0 %v1742_v53 }
  0x84   : > { %1769 = vmatpush3.bf16.msra.mxu1 %v1766_v61 }
  0x85   : > { %1771 = vmatprep.subr.bf16.mxu1 %v1770_v4 }
  0x86   : > { %1745 = vmatpush1.bf16.msra.mxu0 %v1744_v59 }
  0x87   : > { %1747 = vmatprep.subr.bf16.mxu0 %v1746_v62 }
  0x88   : > { %1773 = vmatpush3.bf16.msra.mxu1 %v1770_v4 }
  0x89   : > { %1775 = vmatprep.subr.bf16.mxu1 %v1774_v7 }
  0x8a   : > { %1749 = vmatpush1.bf16.msra.mxu0 %v1748_v3 }
  0x8c   : > { %1777 = vmatpush3.bf16.msra.mxu1 %v1774_v7 }
  0x8d   : > { %360 = vmatmul.mubr.f32.vlgmr.msra.gmra.mrb[0].mxu0 %v2401_v26  ;;  %1779 = vmatprep.subr.bf16.mxu1 %v1778_v11 }
  0x8e   : > { %365 = vmatprep.mubr.f32.mxu0 %v2173_v0 }
  0x90   : > { %1781 = vmatpush3.bf16.msra.mxu1 %v1778_v11 }
  0x91   : > { %366 = vmatmul.mubr.f32.gmra.mrb[2].mxu0 %v246_v10 }
  0x93   : > { %1625 = vmatmul.mubr.f32.vlgmr.msra.gmra.mrb[0].mxu1 %v246_v10 }
 0x160   : > { %v2407_v12 = vpop.f32.mrb[0].mxu0 }
 0x161   : > { %v363_v13 = vpop.f32.mrb[1].mxu0  ;;  %1631 = vmatprep.mubr.msk.f32.mxu1 %vm447_vm0, %v2407_v12 }
 0x164   : > { %v2411_v14 = vpop.f32.mrb[2].mxu0 }
 0x165   : > { %v369_v15 = vpop.f32.mrb[3].mxu0 }
 0x166   : > { %v1782_v16 = vpack.c.bf16 %v369_v15, %v363_v13  ;;  %v2419_v17 = vpack.i.bf16 %v369_v15, %v363_v13  ;;  %v1626_v18 = vpop.f32.mrb[0].mxu1 }
 0x167   : > { %v438_v19 = vpop.f32.mrb[1].mxu1 }
 0x168   : > { %1932 = vrot.lane.b32.xlu1 %v2419_v17, %s2174_s21  ;;  %1784 = vmatprep.subr.msk.bf16.mxu1 %vm2415_vm1, %v1782_v16  ;;  %v1788_v20 = vpack.c.bf16 %v1626_v18, %v438_v19  ;;  %v2429_v21 = vpack.i.bf16 %v1626_v18, %v438_v19 }
 0x169   : > { %1787 = vmatpush3.bf16.xpose.msk.msra.mxu1 %vm2415_vm1, %v1782_v16 }
 0x16a   : > { %1789 = vmatprep.subr.bf16.mxu1 %v1788_v20 }
 0x16c   : > { %1937 = vrot.lane.b32.xlu1 %v2419_v17, %s2175_s23 }
 0x170   : > { %641 = vrot.lane.b32.xlu1 %v2411_v14, %s2174_s21  ;;  %1632 = vmatmul.mubr.msk.f32.vlgmr.msra.gmra.mrb[2].mxu1 %vm447_vm0, %v2411_v14 }
 0x171   : > { %1791 = vmatpush3.bf16.msra.mxu1 %v1788_v20 }
 0x174   : > { %841 = vrot.lane.b32.xlu1 %v2407_v12, %s2175_s23 }
 0x178   : > { %843 = vrot.lane.b32.xlu1 %v2411_v14, %s2175_s23 }
 0x17c   : > { %1942 = vrot.lane.b32.xlu1 %v2429_v21, %s2175_s23 }
 0x1da   : > { %v1933_v22 = vpop.permute.xlu1 %1932 }
 0x1db   : > { %v1935_v23 = vunpack.i.h.bf16 %v1933_v22  ;;  %v1934_v24 = vunpack.i.l.bf16 %v1933_v22 }
 0x1dd   : > { %v1792_v25 = vpack.c.bf16 %v1935_v23, %v1934_v24 }
 0x1de   : > { %v1938_v30 = vpop.permute.xlu1 %1937 }
 0x1df   : > { %1794 = vmatprep.subr.msk.bf16.mxu1 %vm2415_vm1, %v1792_v25  ;;  %v1940_v40 = vunpack.i.h.bf16 %v1938_v30  ;;  %v1939_v41 = vunpack.i.l.bf16 %v1938_v30 }
 0x1e1   : > { %v1802_v44 = vpack.c.bf16 %v1940_v40, %v1939_v41 }
 0x1e2   : > { %v642_v35 = vpop.permute.xlu1 %641 }
 0x1e6   : > { %v842_v38 = vpop.permute.xlu1 %841 }
 0x1ea   : > { %v844_v42 = vpop.permute.xlu1 %843 }
 0x1ee   : > { %v1943_v46 = vpop.permute.xlu1 %1942 }
 0x1ef   : > { %v1945_v47 = vunpack.i.h.bf16 %v1943_v46  ;;  %v1944_v48 = vunpack.i.l.bf16 %v1943_v46 }
 0x1f1   : > { %v1808_v49 = vpack.c.bf16 %v1945_v47, %v1944_v48 }
 0x243   : > { %v1633_v26 = vpop.f32.mrb[2].mxu1 }
 0x244   : > { %v526_v27 = vpop.f32.mrb[3].mxu1  ;;  %v539_v29 = vsel %vm535_vm2, %v1633_v26, -inf }
 0x245   : > { %v536_v28 = vsel %vm535_vm2, %v526_v27, -inf }
 0x246   : > { %537 = vmax.xlane.f32.xlu0 %v536_v28 }
 0x24a   : > { %540 = vmax.xlane.f32.xlu0 %v539_v29 }
 0x260   : > { %639 = vrot.lane.b32.xlu0 %v2407_v12, %s2174_s21 }
 0x2d3   : > { %v538_v31 = vpop.xlane.xlu0 %537 }
 0x2d4   : > { %v542_v32 = vsub.f32 %v526_v27, %v538_v31 }
 0x2d6   : > { %v544_v33 = vmul.f32 1.442695, %v542_v32 }
 0x2d7   : > { %v541_v34 = vpop.xlane.xlu0 %540 }
 0x2d8   : > { %1976 = vpow2.f32 %v544_v33  ;;  %v543_v36 = vsub.f32 %v1633_v26, %v541_v34 }
 0x2da   : > { %v546_v37 = vmul.f32 1.442695, %v543_v36 }
 0x2db   : > { %v640_v45 = vpop.permute.xlu0 %639 }
 0x2dc   : > { %1978 = vpow2.f32 %v546_v37 }
 0x2e2   : > { %v2447_v39 = vpop.eup %1976 }
 0x2e3   : > { %1638 = vmatprep.mubr.msk.f32.mxu1 %vm535_vm2, %v2447_v39 }
 0x2e6   : > { %v2451_v43 = vpop.eup %1978 }
 0x2e7   : > { %1639 = vmatmul.mubr.msk.f32.vlgmr.msra.gmra.mrb[4].mxu1 %vm535_vm2, %v2451_v43  ;;  %v551_v48 = vsel %vm535_vm2, %v2451_v43, 0.0  ;;  %v1273_v43 = vld [vmem:[#allocation7] sm:$0xff] }
 0x2e8   : > { %1797 = vmatpush3.bf16.xpose.msk.msra.mxu1 %vm2415_vm1, %v1792_v25  ;;  %1645 = vmatprep.mubr.msk.f32.mxu1 %vm447_vm0, %v640_v45 }
 0x2e9   : > { %1804 = vmatprep.subr.msk.bf16.mxu1 %vm2415_vm1, %v1802_v44 }
 0x2ef   : > { %1646 = vmatmul.mubr.msk.f32.vlgmr.msra.gmra.mrb[6].mxu1 %vm447_vm0, %v642_v35 }
 0x2f0   : > { %1807 = vmatpush3.bf16.xpose.msk.msra.mxu1 %vm2415_vm1, %v1802_v44  ;;  %1659 = vmatprep.mubr.msk.f32.mxu1 %vm447_vm0, %v842_v38 }
 0x2f1   : > { %1809 = vmatprep.subr.bf16.mxu1 %v1808_v49 }
 0x2f7   : > { %1660 = vmatmul.mubr.msk.f32.vlgmr.msra.gmra.mrb[8].mxu1 %vm447_vm0, %v844_v42 }
 0x2f8   : > { %1811 = vmatpush3.bf16.msra.mxu1 %v1808_v49  ;;  %v548_v49 = vsel %vm535_vm2, %v2447_v39, 0.0 }
 0x3ba   : > { %v2465_v50 = vpop.f32.mrb[4].mxu1 }
 0x3bb   : > { %v2467_v51 = vpop.f32.mrb[5].mxu1 }
 0x3c2   : > { %v1647_v52 = vpop.f32.mrb[6].mxu1 }
 0x3c3   : > { %v721_v53 = vpop.f32.mrb[7].mxu1  ;;  %v733_v58 = vsel %vm535_vm2, %v1647_v52, -inf }
 0x3c4   : > { %v730_v59 = vsel %vm535_vm2, %v721_v53, -inf }
 0x3ca   : > { %v1661_v54 = vpop.f32.mrb[8].mxu1 }
 0x3cb   : > { %v923_v55 = vpop.f32.mrb[9].mxu1  ;;  %v935_v56 = vsel %vm535_vm2, %v1661_v54, -inf }
 0x3cc   : > { %936 = vmax.xlane.f32.xlu0 %v935_v56  ;;  %v932_v57 = vsel %vm535_vm2, %v923_v55, -inf }
 0x3cd   : > { %933 = vmax.xlane.f32.xlu1 %v932_v57 }
 0x3de   : > { %1041 = vrot.lane.b32.xlu1 %v2407_v12, %s2176_s7 }
 0x3e2   : > { %1947 = vrot.lane.b32.xlu0 %v2419_v17, %s2176_s7  ;;  %1043 = vrot.lane.b32.xlu1 %v2411_v14, %s2176_s7 }
 0x401   : > { %734 = vmax.xlane.f32.xlu0 %v733_v58 }
 0x406   : > { %731 = vmax.xlane.f32.xlu1 %v730_v59 }
 0x459   : > { %v937_v60 = vpop.xlane.xlu0 %936 }
 0x45a   : > { %v939_v61 = vsub.f32 %v1661_v54, %v937_v60  ;;  %v934_v62 = vpop.xlane.xlu1 %933 }
 0x45b   : > { %v938_v63 = vsub.f32 %v923_v55, %v934_v62  ;;  %v1275_v62 = vld [vmem:[#allocation7 + $0x10] sm:$0xff] }
 0x45c   : > { %v942_v1 = vmul.f32 1.442695, %v939_v61  ;;  %v1274_v61 = vld [vmem:[#allocation7 + $0x8] sm:$0xff] }
 0x45d   : > { %v940_v2 = vmul.f32 1.442695, %v938_v63  ;;  %v1948_v3 = vpop.permute.xlu0 %1947  ;;  %v1822_v39 = vpack.c.bf16 %v1274_v61, %v1273_v43  ;;  %v1276_v63 = vld [vmem:[#allocation7 + $0x18] sm:$0xff] }
 0x45e   : > { %v1950_v4 = vunpack.i.h.bf16 %v1948_v3  ;;  %v1949_v5 = vunpack.i.l.bf16 %v1948_v3  ;;  %v1042_v9 = vpop.permute.xlu1 %1041  ;;  %v1278_v3 = vld [vmem:[#allocation7 + $0x28] sm:$0xff] }
 0x45f   : > { %1980 = vpow2.f32 %v940_v2  ;;  %v1277_v2 = vld [vmem:[#allocation7 + $0x20] sm:$0xff] }
 0x460   : > { %1982 = vpow2.f32 %v942_v1  ;;  %v1812_v6 = vpack.c.bf16 %v1950_v4, %v1949_v5  ;;  %v1826_v1 = vpack.c.bf16 %v1276_v63, %v1275_v62  ;;  %v1830_v4 = vpack.c.bf16 %v1278_v3, %v1277_v2  ;;  %v1279_v5 = vld [vmem:[#allocation7 + $0x30] sm:$0xff] }
 0x462   : > { %1814 = vmatprep.subr.msk.bf16.mxu1 %vm2415_vm1, %v1812_v6  ;;  %v1044_v10 = vpop.permute.xlu1 %1043 }
 0x469   : > { %v1981_v7 = vpop.eup %1980 }
 0x46a   : > { %v1983_v8 = vpop.eup %1982  ;;  %1666 = vmatprep.mubr.msk.f32.mxu1 %vm535_vm2, %v1981_v7  ;;  %v944_v28 = vsel %vm535_vm2, %v1981_v7, 0.0 }
 0x46b   : > { %1667 = vmatmul.mubr.msk.f32.vlgmr.msra.gmra.mrb[10].mxu1 %vm535_vm2, %v1983_v8  ;;  %v947_v27 = vsel %vm535_vm2, %v1983_v8, 0.0  ;;  %v1281_v8 = vld [vmem:[#allocation7 + $0x40] sm:$0xff] }
 0x46c   : > { %1817 = vmatpush3.bf16.xpose.msk.msra.mxu1 %vm2415_vm1, %v1812_v6  ;;  %1673 = vmatprep.mubr.msk.f32.mxu1 %vm447_vm0, %v1042_v9  ;;  %v1280_v6 = vld [vmem:[#allocation7 + $0x38] sm:$0xff]  ;;  %v1282_v9 = vld [vmem:[#allocation7 + $0x48] sm:$0xff] }
 0x46d   : > { %v1834_v7 = vpack.c.bf16 %v1280_v6, %v1279_v5 }
 0x473   : > { %1674 = vmatmul.mubr.msk.f32.vlgmr.msra.gmra.mrb[12].mxu1 %vm447_vm0, %v1044_v10  ;;  %v1838_v10 = vpack.c.bf16 %v1282_v9, %v1281_v8 }
 0x48e   : > { %v735_v20 = vpop.xlane.xlu0 %734 }
 0x48f   : > { %v737_v22 = vsub.f32 %v1647_v52, %v735_v20 }
 0x491   : > { %v740_v23 = vmul.f32 1.442695, %v737_v22 }
 0x493   : > { %v732_v11 = vpop.xlane.xlu1 %731 }
 0x494   : > { %v736_v12 = vsub.f32 %v721_v53, %v732_v11  ;;  %v1283_v11 = vld [vmem:[#allocation7 + $0x50] sm:$0xff] }
 0x496   : > { %v738_v13 = vmul.f32 1.442695, %v736_v12  ;;  %v1284_v12 = vld [vmem:[#allocation7 + $0x58] sm:$0xff] }
 0x498   : > { %1984 = vpow2.f32 %v738_v13  ;;  %v1842_v13 = vpack.c.bf16 %v1284_v12, %v1283_v11 }
 0x499   : > { %1986 = vpow2.f32 %v740_v23 }
 0x4a2   : > { %v1985_v14 = vpop.eup %1984 }
 0x4a3   : > { %1652 = vmatprep.mubr.msk.f32.mxu0 %vm535_vm2, %v1985_v14  ;;  %v1987_v24 = vpop.eup %1986  ;;  %v742_v25 = vsel %vm535_vm2, %v1985_v14, 0.0  ;;  %v1285_v14 = vld [vmem:[#allocation7 + $0x60] sm:$0xff] }
 0x4a4   : > { %v745_v26 = vsel %vm535_vm2, %v1987_v24, 0.0 }
 0x53e   : > { %v2488_v15 = vpop.f32.mrb[10].mxu1 }
 0x53f   : > { %v2490_v16 = vpop.f32.mrb[11].mxu1 }
 0x546   : > { %v1675_v17 = vpop.f32.mrb[12].mxu1 }
 0x547   : > { %v1123_v18 = vpop.f32.mrb[13].mxu1  ;;  %v1135_v0 = vsel %vm535_vm2, %v1675_v17, -inf }
 0x548   : > { %1136 = vmax.xlane.f32.xlu1 %v1135_v0  ;;  %v1132_v19 = vsel %vm535_vm2, %v1123_v18, -inf  ;;  %v1287_v0 = vld [vmem:[#allocation7 + $0x70] sm:$0xff] }
 0x549   : > { %1133 = vmax.xlane.f32.xlu0 %v1132_v19  ;;  %v1288_v19 = vld [vmem:[#allocation7 + $0x78] sm:$0xff] }
 0x54a   : > { %v1850_v20 = vpack.c.bf16 %v1288_v19, %v1287_v0 }
 0x559   : > { %1957 = vrot.lane.b32.xlu1 %v2429_v21, %s2176_s7 }
 0x55f   : > { %1952 = vrot.lane.b32.xlu0 %v2429_v21, %s2174_s21 }
 0x57d   : > { %743 = vadd.xlane.f32.xlu1 %v742_v25 }
 0x57e   : > { %746 = vadd.xlane.f32.xlu0 %v745_v26 }
 0x581   : > { %948 = vadd.xlane.f32.xlu1 %v947_v27 }
 0x582   : > { %945 = vadd.xlane.f32.xlu0 %v944_v28 }
 0x5d5   : > { %v1137_v29 = vpop.xlane.xlu1 %1136 }
 0x5d6   : > { %v1139_v30 = vsub.f32 %v1675_v17, %v1137_v29  ;;  %v1134_v21 = vpop.xlane.xlu0 %1133 }
 0x5d7   : > { %v1138_v31 = vsub.f32 %v1123_v18, %v1134_v21 }
 0x5d8   : > { %v1142_v32 = vmul.f32 1.442695, %v1139_v30 }
 0x5d9   : > { %v1140_v33 = vmul.f32 1.442695, %v1138_v31  ;;  %v1958_v34 = vpop.permute.xlu1 %1957 }
 0x5da   : > { %1988 = vpow2.f32 %v1142_v32  ;;  %v1960_v35 = vunpack.i.h.bf16 %v1958_v34  ;;  %v1953_v36 = vpop.permute.xlu0 %1952  ;;  %v1959_v37 = vunpack.i.l.bf16 %v1958_v34 }
 0x5db   : > { %1990 = vpow2.f32 %v1140_v33  ;;  %v1955_v38 = vunpack.i.h.bf16 %v1953_v36  ;;  %v1954_v40 = vunpack.i.l.bf16 %v1953_v36 }
 0x5dc   : > { %v1818_v42 = vpack.c.bf16 %v1960_v35, %v1959_v37 }
 0x5dd   : > { %v1798_v41 = vpack.c.bf16 %v1955_v38, %v1954_v40 }
 0x5df   : > { %1799 = vmatprep.subr.bf16.mxu0 %v1798_v41 }
 0x5e0   : > { %1801 = vmatpush3.bf16.msra.mxu0 %v1798_v41 }
 0x5e1   : > { %1819 = vmatprep.subr.bf16.mxu0 %v1818_v42 }
 0x5e3   : > { %1653 = vmatmul.mubr.msk.f32.vlgmr.msra.gmra.mrb[4].mxu0 %vm535_vm2, %v1987_v24 }
 0x5e4   : > { %v1989_v44 = vpop.eup %1988  ;;  %1821 = vmatpush3.bf16.msra.mxu0 %v1818_v42 }
 0x5e5   : > { %v1991_v45 = vpop.eup %1990  ;;  %v1147_v46 = vsel %vm535_vm2, %v1989_v44, 0.0  ;;  %1823 = vmatprep.subr.bf16.mxu0 %v1822_v39 }
 0x5e6   : > { %1680 = vmatprep.mubr.msk.f32.mxu0 %vm535_vm2, %v1991_v45  ;;  %1148 = vadd.xlane.f32.xlu1 %v1147_v46  ;;  %v1144_v47 = vsel %vm535_vm2, %v1991_v45, 0.0 }
 0x5e7   : > { %1145 = vadd.xlane.f32.xlu0 %v1144_v47  ;;  %1681 = vmatmul.mubr.msk.f32.vlgmr.msra.gmra.mrb[6].mxu0 %vm535_vm2, %v1989_v44 }
 0x5e8   : > { %1825 = vmatpush3.bf16.msra.mxu0 %v1822_v39 }
 0x5e9   : > { %1827 = vmatprep.subr.bf16.mxu0 %v1826_v1 }
 0x5ea   : > { %552 = vadd.xlane.f32.xlu1 %v551_v48 }
 0x5eb   : > { %549 = vadd.xlane.f32.xlu0 %v548_v49 }
 0x5ec   : > { %1829 = vmatpush3.bf16.msra.mxu0 %v1826_v1 }
 0x5ed   : > { %1831 = vmatprep.subr.bf16.mxu0 %v1830_v4 }
 0x5f0   : > { %1833 = vmatpush3.bf16.msra.mxu0 %v1830_v4 }
 0x5f1   : > { %1835 = vmatprep.subr.bf16.mxu0 %v1834_v7 }
 0x5f4   : > { %1837 = vmatpush3.bf16.msra.mxu0 %v1834_v7 }
 0x5f5   : > { %1839 = vmatprep.subr.bf16.mxu0 %v1838_v10 }
 0x5f8   : > { %1841 = vmatpush3.bf16.msra.mxu0 %v1838_v10 }
 0x5f9   : > { %1843 = vmatprep.subr.bf16.mxu0 %v1842_v13 }
 0x5fc   : > { %1845 = vmatpush3.bf16.msra.mxu0 %v1842_v13 }
 0x60a   : > { %v744_v52 = vpop.xlane.xlu1 %743 }
 0x60b   : > { %v747_v53 = vpop.xlane.xlu0 %746 }
 0x60e   : > { %v949_v54 = vpop.xlane.xlu1 %948 }
 0x60f   : > { %1992 = vrcp.f32 %v949_v54  ;;  %v946_v55 = vpop.xlane.xlu0 %945 }
 0x610   : > { %1994 = vrcp.f32 %v946_v55 }
 0x611   : > { %1996 = vrcp.f32 %v747_v53 }
 0x612   : > { %1998 = vrcp.f32 %v744_v52 }
 0x619   : > { %v1993_v56 = vpop.eup %1992 }
 0x61a   : > { %v1995_v57 = vpop.eup %1994  ;;  %v1040_v58 = vmul.f32 %v1993_v56, %v2488_v15  ;;  %v1286_v15 = vld [vmem:[#allocation7 + $0x68] sm:$0xff] }
 0x61b   : > { %v1039_v59 = vmul.f32 %v1995_v57, %v2490_v16  ;;  %v1846_v17 = vpack.c.bf16 %v1286_v15, %v1285_v14  ;;  %v1997_v22 = vpop.eup %1996 }
 0x61c   : > { %v1999_v24 = vpop.eup %1998 }
 0x61d   : > { %v1966_v60 = vpack.i.bf16 %v1040_v58, %v1039_v59  ;;  %1847 = vmatprep.subr.bf16.mxu0 %v1846_v17 }
 0x61e   : > { %1849 = vmatpush3.bf16.msra.mxu0 %v1846_v17 }
 0x61f   : > { %1967 = vrot.lane.b32.xlu1 %v1966_v60, %s2175_s23  ;;  %1851 = vmatprep.subr.bf16.mxu0 %v1850_v20 }
 0x622   : > { %1853 = vmatpush3.bf16.msra.mxu0 %v1850_v20 }
 0x673   : > { %v1149_v16 = vpop.xlane.xlu1 %1148 }
 0x674   : > { %v1146_v18 = vpop.xlane.xlu0 %1145  ;;  %2000 = vrcp.f32 %v1149_v16 }
 0x675   : > { %2002 = vrcp.f32 %v1146_v18 }
 0x677   : > { %v553_v35 = vpop.xlane.xlu1 %552 }
 0x678   : > { %v550_v36 = vpop.xlane.xlu0 %549  ;;  %2004 = vrcp.f32 %v553_v35 }
 0x679   : > { %2006 = vrcp.f32 %v550_v36 }
 0x67e   : > { %v2001_v28 = vpop.eup %2000 }
 0x67f   : > { %v2003_v21 = vpop.eup %2002 }
 0x682   : > { %v2005_v37 = vpop.eup %2004 }
 0x683   : > { %v2007_v38 = vpop.eup %2006  ;;  %v638_v46 = vmul.f32 %v2005_v37, %v2465_v50  ;;  %v1516_v50 = vld [vmem:[%s2578_s3] ss:$0 sm:$0xff] }
 0x684   : > { %v637_v42 = vmul.f32 %v2007_v38, %v2467_v51 }
 0x691   : > { %v1968_v40 = vpop.permute.xlu1 %1967 }
 0x692   : > { %v1970_v49 = vunpack.i.h.bf16 %v1968_v40  ;;  %v1969_v52 = vunpack.i.l.bf16 %v1968_v40 }
 0x6b6   : > { %v1654_v23 = vpop.f32.mrb[4].mxu0 }
 0x6b7   : > { %v840_v25 = vmul.f32 %v1997_v22, %v1654_v23  ;;  %v828_v26 = vpop.f32.mrb[5].mxu0 }
 0x6b8   : > { %v839_v27 = vmul.f32 %v1999_v24, %v828_v26 }
 0x6ba   : > { %v1961_v29 = vpack.i.bf16 %v840_v25, %v839_v27  ;;  %v1682_v30 = vpop.f32.mrb[6].mxu0 }
 0x6bb   : > { %v1240_v31 = vmul.f32 %v2001_v28, %v1682_v30  ;;  %v1228_v32 = vpop.f32.mrb[7].mxu0 }
 0x6bc   : > { %v1239_v33 = vmul.f32 %v2003_v21, %v1228_v32  ;;  %1962 = vrot.lane.b32.xlu0 %v1961_v29, %s2176_s7 }
 0x6be   : > { %v1971_v34 = vpack.i.bf16 %v1240_v31, %v1239_v33 }
 0x6c0   : > { %1972 = vrot.lane.b32.xlu1 %v1971_v34, %s2174_s21 }
 0x72e   : > { %v1963_v41 = vpop.permute.xlu0 %1962 }
 0x72f   : > { %v1965_v44 = vunpack.i.h.bf16 %v1963_v41  ;;  %v1964_v45 = vunpack.i.l.bf16 %v1963_v41 }
 0x731   : > { %v1265_v47 = vsel %vm447_vm0, %v637_v42, %v1964_v45  ;;  %v1266_v48 = vsel %vm447_vm0, %v638_v46, %v1965_v44 }
 0x732   : > { %v1973_v53 = vpop.permute.xlu1 %1972  ;;  %v1268_v56 = vsel %vm1267_vm3, %v1265_v47, %v1969_v52  ;;  %v1269_v57 = vsel %vm1267_vm3, %v1266_v48, %v1970_v49 }
 0x733   : > { %v1975_v54 = vunpack.i.h.bf16 %v1973_v53  ;;  %v1974_v55 = vunpack.i.l.bf16 %v1973_v53 }
 0x735   : > { %v1271_v51 = vsel %vm1270_vm4, %v1268_v56, %v1974_v55  ;;  %v1272_v58 = vsel %vm1270_vm4, %v1269_v57, %v1975_v54 }
 0x736   : > { %1715 = vmatprep.mubr.f32.mxu0 %v1271_v51 }
 0x737   : > { %1716 = vmatmul.mubr.f32.vlgmr.msra.gmra.mrb[8].mxu0 %v1272_v58 }
 0x80a   : > { %v1717_v59 = vpop.f32.mrb[8].mxu0 }
 0x80b   : > { %v1368_v60 = vadd.f32 %v1717_v59, %v1516_v50  ;;  %v1362_v43 = vpop.f32.mrb[9].mxu0 }
 0x80c   : > { %v1363_v61 = vadd.f32 %v1516_v50, %v1362_v43 }
 0x80d   : > { %1372 = vst [vmem:[%s244_s8 + $0x8] sm:$0xff] %v1368_v60 }
 0x80e   : > { %1371 = vst [vmem:[%s244_s8] sm:$0xff] %v1363_v61 }
 0x80f   : > { %2107 = shalt.err (!%p2104_p2)
}
 0x810   : > { %s2108_s25 = scalar_lea.hbm %s2531_s29, 256  ;;  %s2112_s7 = scalar_lea.hbm %s2579_s4, 512 }
 0x811   : > { %p2109_p13 = scmp.ne.s32.totalorder %s2531_s29, %s2108_s25  ;;  %p2113_p4 = scmp.lt.u32.totalorder %s2531_s29, %s2579_s4 }
 0x812   : > { %p2114_p7 = scmp.lt.u32.totalorder %s2112_s7, %s2108_s25  ;;  %p2116_p11 = scmp.lt.u32.totalorder %s2108_s25, %s2531_s29 }
 0x813   : > { %p2110_p6 = pnand %p2109_p13, %p2595_p0 }
 0x814   : > { %p2115_p8 = por %p2114_p7, %p2113_p4 }
 0x815   : > { %p2111_p10 = pneg %p2110_p6 }
 0x816   : > { %p2117_p1 = por %p2116_p11, %p2115_p8 }
 0x818   : > { %p2118_p3 = pnand %p2117_p1, %p2111_p10 }
 0x81a   : > { %2121 = shalt.err (!%p2118_p3)
}
 0x81b   : > { %s2178_s9 = smov 128   ;;  %s2179_s28 = smov 8  }
 0x81c   : > { %1864 = dma.vmem_to_hbm [thread:$0]  (%p2595_p0), %s2526_s30, 256, %s2531_s29, %s1374_s5, %s2178_s9, %s2178_s9, %s2179_s28  }
 0x81d PF: > { %s1402_s27 = sand.u32 1, %s2152_s15   ;;  %p2596_p5 = scmp.ne.s32.totalorder %s2584_s22, 0 }
 0x81e   : > { %p2597_p9 = scmp.ge.s32.totalorder %s2164_s18, 2  ;;  %s1403_s20 = scalar_lea.sflag [#allocation4], %s1402_s27 }
 0x820   : > { %p1878_p12 = pnand %p2597_p9, %p2596_p5 }
 0x822   : > { %2147 = dma.done.wait (!%p1878_p12), %s1403_s20, 256  }
 0x823   : > { %2149 = vsyncadd (!%p1878_p12), %s1403_s20, 4294967040  ;;  %p18_p2 = scmp.ge.s32.totalorder %s2318_s11, 4   ;;  %s2598_s15 = smov %s2156_s16 }
 0x824   : > { %s2599_s16 = smov %s2160_s17  ;;  %s2600_s17 = smov %s2327_s14 }
 0x825   : > { %s2601_s18 = smov %s2318_s11  ;;  %20 = sbr.rel (!%p18_p2) target bundleno = 6 (0x6), region = 89 }
 0x82c   :  { %1408 = vsyncpa [#allocation3], 1 }
 0x82d   :  { %1410 = vsyncpa [#allocation3 + $0x1], 1 }
 0x82e   :  { %1411 = vsyncpa [#allocation6], 1 }
 0x82f   :  { %1412 = vsyncpa [#allocation4], 1 }
 0x830   :  { %1414 = vsyncpa [#allocation4 + $0x1], 1 }

</bundles_post_ra>
